<compile_context>
chip_gen: v7x
topology: tpu7x:2x2x1
jax: 0.10.0
libtpu: 0.0.40
codegen_flags: <defaults>
</compile_context>

<pallas_src>
import functools

import jax
import jax.numpy as jnp
from jax.experimental import pallas as pl
from jax.experimental.pallas import tpu as pltpu


# --------------------------------------------------------------------------
# Helpers
# --------------------------------------------------------------------------
def _round_up(x, k):
    return ((x + k - 1) // k) * k


def _vmem_capacity_bytes():
    """Physical VMEM of the current chip (128 MiB v5e/v6e, 64 MiB v7x)."""
    try:
        info = pltpu.get_tpu_info()
        cap = getattr(info, "vmem_capacity_bytes", None)
        if cap:
            return int(cap)
    except Exception:
        pass
    return 128 * 1024 * 1024


def _choose_tile_n(n, m, d, itemsize, vmem_cap):
    """Largest N-tile (multiple of 8) sized off the chip's VMEM capacity.

    Accounts for (8,128) layout padding of the (M, D) minor dims and for the
    f32 working set of the weighted-sum pass.
    """
    m_pad = _round_up(max(m, 1), 8)
    d_pad = _round_up(max(d, 1), 128)
    bytes_per_node = m_pad * d_pad * (itemsize + 4)
    target = max(1 << 20, vmem_cap // 12)          # ~10.7 MiB on 128 MiB chips
    tile = max(8, (target // bytes_per_node) // 8 * 8)
    tile = min(tile, 4096, _round_up(max(n, 8), 8))
    return int(max(8, tile))


# --------------------------------------------------------------------------
# Pass 1 (tiled path): per-metapath logit sums, accumulated per core
# --------------------------------------------------------------------------
def _logit_sums_kernel(z_ref, w1_ref, b1_ref, w2t_ref, acc_ref, *,
                       tile_n, tiles_per_core, num_nodes, num_meta):
    c = pl.program_id(0)          # core-split ("parallel") axis
    i = pl.program_id(1)          # reduction ("arbitrary") axis

    @pl.when(i == 0)
    def _init():
        acc_ref[...] = jnp.zeros_like(acc_ref)

    # Projection per metapath: (tile_n, D) @ (D, H) MXU matmul in the native
    # input dtype (bf16-native when inputs are bf16), tanh on the EUP, then
    # the second Linear (H -> 1, no bias) as a VPU multiply + lane reduce.
    logits = []
    for m in range(num_meta):
        zm = z_ref[:, m, :]                                            # (tn, D)
        h = jnp.tanh(jnp.dot(zm, w1_ref[...],
                             preferred_element_type=jnp.float32) + b1_ref[...])
        logits.append(jnp.sum(h * w2t_ref[...], axis=-1, keepdims=True))

    lane = jax.lax.broadcasted_iota(jnp.int32, (1, num_meta), 1)       # (1, M)

    def _accumulate(node_mask):
        row = jnp.zeros((1, num_meta), jnp.float32)
        for m in range(num_meta):
            lg = logits[m]
            if node_mask is not None:
                lg = jnp.where(node_mask, lg, 0.0)
            s = jnp.sum(lg, axis=0, keepdims=True)                     # (1, 1)
            row = row + s * (lane == m).astype(jnp.float32)            # (1, M)
        acc_ref[...] += row

    n0 = (c * tiles_per_core + i) * tile_n
    needs_mask = n0 + tile_n > num_nodes          # only tiles touching padding

    @pl.when(jnp.logical_not(needs_mask))
    def _acc_fast():
        _accumulate(None)

    @pl.when(needs_mask)
    def _acc_masked():
        node = n0 + jax.lax.broadcasted_iota(jnp.int32, (tile_n, 1), 0)
        _accumulate(node < num_nodes)


# --------------------------------------------------------------------------
# Pass 2 (tiled path): out[n, :] = sum_m beta[m] * z[n, m, :]
# --------------------------------------------------------------------------
def _weighted_sum_kernel(beta_ref, z_ref, out_ref):
    # beta_ref: (1, M, D) f32 (resident); z_ref: (tn, M, D); out_ref: (tn, D)
    out_ref[...] = jnp.sum(beta_ref[...] * z_ref[...], axis=1).astype(out_ref.dtype)


# --------------------------------------------------------------------------
# Fused fast path: one HBM read of z, everything in a single kernel
# --------------------------------------------------------------------------
def _fused_kernel(z_ref, w1_ref, b1_ref, w2t_ref, out_ref, *,
                  num_nodes, num_meta):
    n_rows = z_ref.shape[0]
    lane = jax.lax.broadcasted_iota(jnp.int32, (1, num_meta), 1)       # (1, M)

    if n_rows > num_nodes:
        node = jax.lax.broadcasted_iota(jnp.int32, (n_rows, 1), 0)
        valid = node < num_nodes
    else:
        valid = None

    # Per-metapath logit sums.
    w_row = jnp.zeros((1, num_meta), jnp.float32)
    for m in range(num_meta):
        zm = z_ref[:, m, :]
        h = jnp.tanh(jnp.dot(zm, w1_ref[...],
                             preferred_element_type=jnp.float32) + b1_ref[...])
        lg = jnp.sum(h * w2t_ref[...], axis=-1, keepdims=True)         # (n, 1)
        if valid is not None:
            lg = jnp.where(valid, lg, 0.0)
        w_row = w_row + jnp.sum(lg, axis=0, keepdims=True) * (
            lane == m).astype(jnp.float32)

    # Mean over nodes + softmax over metapaths (f32).
    w_row = w_row * (1.0 / num_nodes)
    w_row = w_row - jnp.max(w_row, axis=-1, keepdims=True)
    e = jnp.exp(w_row)
    beta = e / jnp.sum(e, axis=-1, keepdims=True)                      # (1, M)

    # Weighted sum over metapaths.
    acc = None
    for m in range(num_meta):
        bm = jnp.sum(beta * (lane == m).astype(jnp.float32),
                     axis=-1, keepdims=True)                           # (1, 1)
        term = bm * z_ref[:, m, :]
        acc = term if acc is None else acc + term
    out_ref[...] = acc.astype(out_ref.dtype)


# --------------------------------------------------------------------------
# Wrapper
# --------------------------------------------------------------------------
def semantic_attention(z, w1, b1, w2, *, tile_n=None, force_tiled=False):
    """z: (N, M, D); w1: (D, H); b1: (H,); w2: (H, 1)  ->  (N, D)."""
    N, M, D = z.shape
    H = w1.shape[1]
    out_dtype = z.dtype
    itemsize = jnp.dtype(z.dtype).itemsize

    b1_2d = b1.reshape(1, H)
    w2t = w2.reshape(1, H)             # second Linear (H -> 1, no bias), on VPU

    vmem_cap = _vmem_capacity_bytes()
    vmem_limit = int(min(vmem_cap * 3 // 4, 96 * 1024 * 1024))

    m_pad = _round_up(M, 8)
    d_pad = _round_up(D, 128)

    # ---------------- fused single-read fast path --------------------------
    n_pad8 = _round_up(N, 8)
    fused_block_bytes = n_pad8 * m_pad * d_pad * max(itemsize, 4)
    use_fused = ((not force_tiled) and tile_n is None and M <= 64
                 and fused_block_bytes * 5 <= vmem_limit)

    if use_fused:
        z_p = z if n_pad8 == N else jnp.pad(z, ((0, n_pad8 - N), (0, 0), (0, 0)))
        out_p = pl.pallas_call(
            functools.partial(_fused_kernel, num_nodes=N, num_meta=M),
            out_shape=jax.ShapeDtypeStruct((n_pad8, D), out_dtype),
            grid=(1,),
            in_specs=[
                pl.BlockSpec((n_pad8, M, D), lambda i: (0, 0, 0)),
                pl.BlockSpec((D, H), lambda i: (0, 0)),
                pl.BlockSpec((1, H), lambda i: (0, 0)),
                pl.BlockSpec((1, H), lambda i: (0, 0)),
            ],
            out_specs=pl.BlockSpec((n_pad8, D), lambda i: (0, 0)),
            compiler_params=pltpu.CompilerParams(
                dimension_semantics=("arbitrary",),
                vmem_limit_bytes=vmem_limit),
        )(z_p, w1, b1_2d, w2t)
        return out_p[:N]

    # ---------------- tiled two-pass path -----------------------------------
    if tile_n is None:
        tile_n = _choose_tile_n(N, M, D, itemsize, vmem_cap)
    tile_n = max(8, (int(tile_n) // 8) * 8)

    num_tiles = -(-N // tile_n)
    cores = 2 if num_tiles >= 2 else 1        # v7x megacore split for pass 1
    num_tiles = _round_up(num_tiles, cores)
    tiles_per_core = num_tiles // cores
    n_pad = num_tiles * tile_n
    z_p = z if n_pad == N else jnp.pad(z, ((0, n_pad - N), (0, 0), (0, 0)))

    # Pass 1: per-metapath logit sums (one accumulator per core).
    kern1 = functools.partial(
        _logit_sums_kernel, tile_n=tile_n, tiles_per_core=tiles_per_core,
        num_nodes=N, num_meta=M)

    part = pl.pallas_call(
        kern1,
        out_shape=jax.ShapeDtypeStruct((cores, 1, M), jnp.float32),
        grid=(cores, tiles_per_core),
        in_specs=[
            pl.BlockSpec((tile_n, M, D),
                         lambda c, i: (c * tiles_per_core + i, 0, 0)),
            pl.BlockSpec((D, H), lambda c, i: (0, 0)),
            pl.BlockSpec((1, H), lambda c, i: (0, 0)),
            pl.BlockSpec((1, H), lambda c, i: (0, 0)),
        ],
        out_specs=pl.BlockSpec((None, 1, M), lambda c, i: (c, 0, 0)),
        compiler_params=pltpu.CompilerParams(
            dimension_semantics=("parallel", "arbitrary"),
            vmem_limit_bytes=vmem_limit),
    )(z_p, w1, b1_2d, w2t)

    # Mean over nodes + softmax over metapaths: M scalars -> plain JAX.
    w_mean = part.reshape(cores, M).sum(axis=0) * (1.0 / N)
    beta = jax.nn.softmax(w_mean.astype(jnp.float32), axis=-1)          # (M,)
    beta_b = jnp.broadcast_to(beta.reshape(1, M, 1), (1, M, D)).astype(jnp.float32)

    # Pass 2: out[n, :] = sum_m beta[m] * z[n, m, :]  (lane-dense stores).
    out_p = pl.pallas_call(
        _weighted_sum_kernel,
        out_shape=jax.ShapeDtypeStruct((n_pad, D), out_dtype),
        grid=(num_tiles,),
        in_specs=[
            pl.BlockSpec((1, M, D), lambda i: (0, 0, 0)),
            pl.BlockSpec((tile_n, M, D), lambda i: (i, 0, 0)),
        ],
        out_specs=pl.BlockSpec((tile_n, D), lambda i: (i, 0)),
        compiler_params=pltpu.CompilerParams(
            dimension_semantics=("parallel",),
            vmem_limit_bytes=vmem_limit),
    )(beta_b, z_p)

    return out_p[:N]


# --------------------------------------------------------------------------
# Pure-JAX reference (mirrors the torch module)
# --------------------------------------------------------------------------
def semantic_attention_ref(z, w1, b1, w2):
    w = jnp.tanh(z @ w1 + b1) @ w2                       # (N, M, 1)
    w = w.mean(axis=0)                                   # (M, 1)
    beta = jax.nn.softmax(w, axis=0)                     # (M, 1)
    beta = jnp.broadcast_to(beta, (z.shape[0],) + beta.shape)
    return (beta * z).sum(axis=1)                        # (N, D)


if __name__ == "__main__":
    # Small demo shapes; N deliberately NOT a multiple of 8 / the tile so the
    # padding / masking / multi-tile / core-split paths are exercised.
    N, M, in_size, hidden = 20, 4, 16, 32

    key = jax.random.PRNGKey(0)
    kz, kw1, kb1, kw2 = jax.random.split(key, 4)

    z = jax.random.normal(kz, (N, M, in_size), dtype=jnp.float32)
    w1 = jax.random.normal(kw1, (in_size, hidden), dtype=jnp.float32) * 0.1
    b1 = jax.random.normal(kb1, (hidden,), dtype=jnp.float32) * 0.1
    w2 = jax.random.normal(kw2, (hidden, 1), dtype=jnp.float32) * 0.1

    ref = semantic_attention_ref(z, w1, b1, w2)

    # Fused single-read fast path (default dispatch at this size).
    out_fused = jax.block_until_ready(semantic_attention(z, w1, b1, w2))
    assert out_fused.shape == (N, in_size)
    assert jnp.allclose(out_fused, ref, atol=1e-5, rtol=1e-5), float(
        jnp.max(jnp.abs(out_fused - ref)))

    # Tiled two-pass path (multi-tile grid, core split, padding mask).
    out_tiled = jax.block_until_ready(
        semantic_attention(z, w1, b1, w2, tile_n=8, force_tiled=True))
    assert out_tiled.shape == (N, in_size)
    assert jnp.allclose(out_tiled, ref, atol=1e-5, rtol=1e-5), float(
        jnp.max(jnp.abs(out_tiled - ref)))

    print("KERNEL_OK")
</pallas_src>

<mosaic_0001>
module attributes {stable_mosaic.version = 11 : i64} {
  func.func @_fused_kernel(%arg0: i32, %arg1: memref<24x4x16xf32, #tpu.memory_space<vmem>>, %arg2: memref<16x32xf32, #tpu.memory_space<vmem>>, %arg3: memref<1x32xf32, #tpu.memory_space<vmem>>, %arg4: memref<1x32xf32, #tpu.memory_space<vmem>>, %arg5: memref<24x16xf32, #tpu.memory_space<vmem>>) attributes {dimension_semantics = [#tpu.dimension_semantics<arbitrary>], iteration_bounds = array<i64: 1>, scalar_prefetch = 0 : i64, scratch_operands = 0 : i64, tpu.core_type = #tpu.core_type<tc>, window_params = [{pipeline_mode = #tpu.pipeline_mode<synchronous>, transform_indices = @transform_0, window_bounds = array<i64: 24, 4, 16>}, {pipeline_mode = #tpu.pipeline_mode<synchronous>, transform_indices = @transform_1, window_bounds = array<i64: 16, 32>}, {pipeline_mode = #tpu.pipeline_mode<synchronous>, transform_indices = @transform_2, window_bounds = array<i64: 1, 32>}, {pipeline_mode = #tpu.pipeline_mode<synchronous>, transform_indices = @transform_3, window_bounds = array<i64: 1, 32>}, {pipeline_mode = #tpu.pipeline_mode<synchronous>, transform_indices = @transform_4, window_bounds = array<i64: 24, 16>}]} {
    %0 = tpu.iota {dimensions = array<i32: 1>} : vector<1x4xi32>
    %1 = tpu.iota {dimensions = array<i32: 0>} : vector<24x1xi32>
    %c20_i32 = arith.constant 20 : i32
    %2 = vector.broadcast %c20_i32 : i32 to vector<24x1xi32>
    %3 = arith.cmpi slt, %1, %2 : vector<24x1xi32>
    %cst = arith.constant 0.000000e+00 : f32
    %4 = vector.broadcast %cst : f32 to vector<1x4xf32>
    %c0 = arith.constant 0 : index
    %c0_0 = arith.constant 0 : index
    %c0_1 = arith.constant 0 : index
    %5 = vector.load %arg1[%c0, %c0_0, %c0_1] : memref<24x4x16xf32, #tpu.memory_space<vmem>>, vector<24x1x16xf32>
    %6 = vector.shape_cast %5 : vector<24x1x16xf32> to vector<24x16xf32>
    %c0_2 = arith.constant 0 : index
    %c0_3 = arith.constant 0 : index
    %7 = vector.load %arg2[%c0_2, %c0_3] : memref<16x32xf32, #tpu.memory_space<vmem>>, vector<16x32xf32>
    %cst_4 = arith.constant dense<0.000000e+00> : vector<24x32xf32>
    %8 = tpu.matmul %6, %7, %cst_4 {dimension_numbers = #tpu.dot_dimension_numbers<[1], [0], [0], [1], [0, 0, 1, 1], [], []>} : vector<24x16xf32>, vector<16x32xf32>, vector<24x32xf32> -> vector<24x32xf32>
    %c0_5 = arith.constant 0 : index
    %c0_6 = arith.constant 0 : index
    %9 = vector.load %arg3[%c0_5, %c0_6] : memref<1x32xf32, #tpu.memory_space<vmem>>, vector<1x32xf32>
    %10 = vector.broadcast %9 : vector<1x32xf32> to vector<24x32xf32>
    %11 = arith.addf %8, %10 : vector<24x32xf32>
    %12 = math.tanh %11 : vector<24x32xf32>
    %c0_7 = arith.constant 0 : index
    %c0_8 = arith.constant 0 : index
    %13 = vector.load %arg4[%c0_7, %c0_8] : memref<1x32xf32, #tpu.memory_space<vmem>>, vector<1x32xf32>
    %14 = vector.broadcast %13 : vector<1x32xf32> to vector<24x32xf32>
    %15 = arith.mulf %12, %14 : vector<24x32xf32>
    %cst_9 = arith.constant dense<0.000000e+00> : vector<24xf32>
    %16 = vector.multi_reduction <add>, %15, %cst_9 [1] : vector<24x32xf32> to vector<24xf32>
    %17 = vector.shape_cast %16 : vector<24xf32> to vector<24x1xf32>
    %cst_10 = arith.constant 0.000000e+00 : f32
    %18 = vector.broadcast %cst_10 : f32 to vector<24x1xf32>
    %19 = arith.select %3, %17, %18 : vector<24x1xi1>, vector<24x1xf32>
    %cst_11 = arith.constant dense<0.000000e+00> : vector<1xf32>
    %20 = vector.multi_reduction <add>, %19, %cst_11 [0] : vector<24x1xf32> to vector<1xf32>
    %21 = vector.shape_cast %20 : vector<1xf32> to vector<1x1xf32>
    %c0_i32 = arith.constant 0 : i32
    %22 = vector.broadcast %c0_i32 : i32 to vector<1x4xi32>
    %23 = arith.cmpi eq, %0, %22 : vector<1x4xi32>
    %24 = arith.extui %23 : vector<1x4xi1> to vector<1x4xi32>
    %25 = arith.sitofp %24 : vector<1x4xi32> to vector<1x4xf32>
    %26 = vector.broadcast %21 : vector<1x1xf32> to vector<1x4xf32>
    %27 = arith.mulf %26, %25 : vector<1x4xf32>
    %28 = arith.addf %4, %27 : vector<1x4xf32>
    %c0_12 = arith.constant 0 : index
    %c1 = arith.constant 1 : index
    %c0_13 = arith.constant 0 : index
    %29 = vector.load %arg1[%c0_12, %c1, %c0_13] : memref<24x4x16xf32, #tpu.memory_space<vmem>>, vector<24x1x16xf32>
    %30 = vector.shape_cast %29 : vector<24x1x16xf32> to vector<24x16xf32>
    %c0_14 = arith.constant 0 : index
    %c0_15 = arith.constant 0 : index
    %31 = vector.load %arg2[%c0_14, %c0_15] : memref<16x32xf32, #tpu.memory_space<vmem>>, vector<16x32xf32>
    %cst_16 = arith.constant dense<0.000000e+00> : vector<24x32xf32>
    %32 = tpu.matmul %30, %31, %cst_16 {dimension_numbers = #tpu.dot_dimension_numbers<[1], [0], [0], [1], [0, 0, 1, 1], [], []>} : vector<24x16xf32>, vector<16x32xf32>, vector<24x32xf32> -> vector<24x32xf32>
    %c0_17 = arith.constant 0 : index
    %c0_18 = arith.constant 0 : index
    %33 = vector.load %arg3[%c0_17, %c0_18] : memref<1x32xf32, #tpu.memory_space<vmem>>, vector<1x32xf32>
    %34 = vector.broadcast %33 : vector<1x32xf32> to vector<24x32xf32>
    %35 = arith.addf %32, %34 : vector<24x32xf32>
    %36 = math.tanh %35 : vector<24x32xf32>
    %c0_19 = arith.constant 0 : index
    %c0_20 = arith.constant 0 : index
    %37 = vector.load %arg4[%c0_19, %c0_20] : memref<1x32xf32, #tpu.memory_space<vmem>>, vector<1x32xf32>
    %38 = vector.broadcast %37 : vector<1x32xf32> to vector<24x32xf32>
    %39 = arith.mulf %36, %38 : vector<24x32xf32>
    %cst_21 = arith.constant dense<0.000000e+00> : vector<24xf32>
    %40 = vector.multi_reduction <add>, %39, %cst_21 [1] : vector<24x32xf32> to vector<24xf32>
    %41 = vector.shape_cast %40 : vector<24xf32> to vector<24x1xf32>
    %cst_22 = arith.constant 0.000000e+00 : f32
    %42 = vector.broadcast %cst_22 : f32 to vector<24x1xf32>
    %43 = arith.select %3, %41, %42 : vector<24x1xi1>, vector<24x1xf32>
    %cst_23 = arith.constant dense<0.000000e+00> : vector<1xf32>
    %44 = vector.multi_reduction <add>, %43, %cst_23 [0] : vector<24x1xf32> to vector<1xf32>
    %45 = vector.shape_cast %44 : vector<1xf32> to vector<1x1xf32>
    %c1_i32 = arith.constant 1 : i32
    %46 = vector.broadcast %c1_i32 : i32 to vector<1x4xi32>
    %47 = arith.cmpi eq, %0, %46 : vector<1x4xi32>
    %48 = arith.extui %47 : vector<1x4xi1> to vector<1x4xi32>
    %49 = arith.sitofp %48 : vector<1x4xi32> to vector<1x4xf32>
    %50 = vector.broadcast %45 : vector<1x1xf32> to vector<1x4xf32>
    %51 = arith.mulf %50, %49 : vector<1x4xf32>
    %52 = arith.addf %28, %51 : vector<1x4xf32>
    %c0_24 = arith.constant 0 : index
    %c2 = arith.constant 2 : index
    %c0_25 = arith.constant 0 : index
    %53 = vector.load %arg1[%c0_24, %c2, %c0_25] : memref<24x4x16xf32, #tpu.memory_space<vmem>>, vector<24x1x16xf32>
    %54 = vector.shape_cast %53 : vector<24x1x16xf32> to vector<24x16xf32>
    %c0_26 = arith.constant 0 : index
    %c0_27 = arith.constant 0 : index
    %55 = vector.load %arg2[%c0_26, %c0_27] : memref<16x32xf32, #tpu.memory_space<vmem>>, vector<16x32xf32>
    %cst_28 = arith.constant dense<0.000000e+00> : vector<24x32xf32>
    %56 = tpu.matmul %54, %55, %cst_28 {dimension_numbers = #tpu.dot_dimension_numbers<[1], [0], [0], [1], [0, 0, 1, 1], [], []>} : vector<24x16xf32>, vector<16x32xf32>, vector<24x32xf32> -> vector<24x32xf32>
    %c0_29 = arith.constant 0 : index
    %c0_30 = arith.constant 0 : index
    %57 = vector.load %arg3[%c0_29, %c0_30] : memref<1x32xf32, #tpu.memory_space<vmem>>, vector<1x32xf32>
    %58 = vector.broadcast %57 : vector<1x32xf32> to vector<24x32xf32>
    %59 = arith.addf %56, %58 : vector<24x32xf32>
    %60 = math.tanh %59 : vector<24x32xf32>
    %c0_31 = arith.constant 0 : index
    %c0_32 = arith.constant 0 : index
    %61 = vector.load %arg4[%c0_31, %c0_32] : memref<1x32xf32, #tpu.memory_space<vmem>>, vector<1x32xf32>
    %62 = vector.broadcast %61 : vector<1x32xf32> to vector<24x32xf32>
    %63 = arith.mulf %60, %62 : vector<24x32xf32>
    %cst_33 = arith.constant dense<0.000000e+00> : vector<24xf32>
    %64 = vector.multi_reduction <add>, %63, %cst_33 [1] : vector<24x32xf32> to vector<24xf32>
    %65 = vector.shape_cast %64 : vector<24xf32> to vector<24x1xf32>
    %cst_34 = arith.constant 0.000000e+00 : f32
    %66 = vector.broadcast %cst_34 : f32 to vector<24x1xf32>
    %67 = arith.select %3, %65, %66 : vector<24x1xi1>, vector<24x1xf32>
    %cst_35 = arith.constant dense<0.000000e+00> : vector<1xf32>
    %68 = vector.multi_reduction <add>, %67, %cst_35 [0] : vector<24x1xf32> to vector<1xf32>
    %69 = vector.shape_cast %68 : vector<1xf32> to vector<1x1xf32>
    %c2_i32 = arith.constant 2 : i32
    %70 = vector.broadcast %c2_i32 : i32 to vector<1x4xi32>
    %71 = arith.cmpi eq, %0, %70 : vector<1x4xi32>
    %72 = arith.extui %71 : vector<1x4xi1> to vector<1x4xi32>
    %73 = arith.sitofp %72 : vector<1x4xi32> to vector<1x4xf32>
    %74 = vector.broadcast %69 : vector<1x1xf32> to vector<1x4xf32>
    %75 = arith.mulf %74, %73 : vector<1x4xf32>
    %76 = arith.addf %52, %75 : vector<1x4xf32>
    %c0_36 = arith.constant 0 : index
    %c3 = arith.constant 3 : index
    %c0_37 = arith.constant 0 : index
    %77 = vector.load %arg1[%c0_36, %c3, %c0_37] : memref<24x4x16xf32, #tpu.memory_space<vmem>>, vector<24x1x16xf32>
    %78 = vector.shape_cast %77 : vector<24x1x16xf32> to vector<24x16xf32>
    %c0_38 = arith.constant 0 : index
    %c0_39 = arith.constant 0 : index
    %79 = vector.load %arg2[%c0_38, %c0_39] : memref<16x32xf32, #tpu.memory_space<vmem>>, vector<16x32xf32>
    %cst_40 = arith.constant dense<0.000000e+00> : vector<24x32xf32>
    %80 = tpu.matmul %78, %79, %cst_40 {dimension_numbers = #tpu.dot_dimension_numbers<[1], [0], [0], [1], [0, 0, 1, 1], [], []>} : vector<24x16xf32>, vector<16x32xf32>, vector<24x32xf32> -> vector<24x32xf32>
    %c0_41 = arith.constant 0 : index
    %c0_42 = arith.constant 0 : index
    %81 = vector.load %arg3[%c0_41, %c0_42] : memref<1x32xf32, #tpu.memory_space<vmem>>, vector<1x32xf32>
    %82 = vector.broadcast %81 : vector<1x32xf32> to vector<24x32xf32>
    %83 = arith.addf %80, %82 : vector<24x32xf32>
    %84 = math.tanh %83 : vector<24x32xf32>
    %c0_43 = arith.constant 0 : index
    %c0_44 = arith.constant 0 : index
    %85 = vector.load %arg4[%c0_43, %c0_44] : memref<1x32xf32, #tpu.memory_space<vmem>>, vector<1x32xf32>
    %86 = vector.broadcast %85 : vector<1x32xf32> to vector<24x32xf32>
    %87 = arith.mulf %84, %86 : vector<24x32xf32>
    %cst_45 = arith.constant dense<0.000000e+00> : vector<24xf32>
    %88 = vector.multi_reduction <add>, %87, %cst_45 [1] : vector<24x32xf32> to vector<24xf32>
    %89 = vector.shape_cast %88 : vector<24xf32> to vector<24x1xf32>
    %cst_46 = arith.constant 0.000000e+00 : f32
    %90 = vector.broadcast %cst_46 : f32 to vector<24x1xf32>
    %91 = arith.select %3, %89, %90 : vector<24x1xi1>, vector<24x1xf32>
    %cst_47 = arith.constant dense<0.000000e+00> : vector<1xf32>
    %92 = vector.multi_reduction <add>, %91, %cst_47 [0] : vector<24x1xf32> to vector<1xf32>
    %93 = vector.shape_cast %92 : vector<1xf32> to vector<1x1xf32>
    %c3_i32 = arith.constant 3 : i32
    %94 = vector.broadcast %c3_i32 : i32 to vector<1x4xi32>
    %95 = arith.cmpi eq, %0, %94 : vector<1x4xi32>
    %96 = arith.extui %95 : vector<1x4xi1> to vector<1x4xi32>
    %97 = arith.sitofp %96 : vector<1x4xi32> to vector<1x4xf32>
    %98 = vector.broadcast %93 : vector<1x1xf32> to vector<1x4xf32>
    %99 = arith.mulf %98, %97 : vector<1x4xf32>
    %100 = arith.addf %76, %99 : vector<1x4xf32>
    %cst_48 = arith.constant 5.000000e-02 : f32
    %101 = vector.broadcast %cst_48 : f32 to vector<1x4xf32>
    %102 = arith.mulf %100, %101 : vector<1x4xf32>
    %cst_49 = arith.constant dense<0xFF800000> : vector<1xf32>
    %103 = vector.multi_reduction <maximumf>, %102, %cst_49 [1] : vector<1x4xf32> to vector<1xf32>
    %104 = vector.shape_cast %103 : vector<1xf32> to vector<1x1xf32>
    %105 = vector.broadcast %104 : vector<1x1xf32> to vector<1x4xf32>
    %106 = arith.subf %102, %105 : vector<1x4xf32>
    %107 = math.exp %106 : vector<1x4xf32>
    %cst_50 = arith.constant dense<0.000000e+00> : vector<1xf32>
    %108 = vector.multi_reduction <add>, %107, %cst_50 [1] : vector<1x4xf32> to vector<1xf32>
    %109 = vector.shape_cast %108 : vector<1xf32> to vector<1x1xf32>
    %110 = vector.broadcast %109 : vector<1x1xf32> to vector<1x4xf32>
    %111 = arith.divf %107, %110 : vector<1x4xf32>
    %c0_i32_51 = arith.constant 0 : i32
    %112 = vector.broadcast %c0_i32_51 : i32 to vector<1x4xi32>
    %113 = arith.cmpi eq, %0, %112 : vector<1x4xi32>
    %114 = arith.extui %113 : vector<1x4xi1> to vector<1x4xi32>
    %115 = arith.sitofp %114 : vector<1x4xi32> to vector<1x4xf32>
    %116 = arith.mulf %111, %115 : vector<1x4xf32>
    %cst_52 = arith.constant dense<0.000000e+00> : vector<1xf32>
    %117 = vector.multi_reduction <add>, %116, %cst_52 [1] : vector<1x4xf32> to vector<1xf32>
    %118 = vector.shape_cast %117 : vector<1xf32> to vector<1x1xf32>
    %c0_53 = arith.constant 0 : index
    %c0_54 = arith.constant 0 : index
    %c0_55 = arith.constant 0 : index
    %119 = vector.load %arg1[%c0_53, %c0_54, %c0_55] : memref<24x4x16xf32, #tpu.memory_space<vmem>>, vector<24x1x16xf32>
    %120 = vector.shape_cast %119 : vector<24x1x16xf32> to vector<24x16xf32>
    %121 = vector.broadcast %118 : vector<1x1xf32> to vector<24x16xf32>
    %122 = arith.mulf %121, %120 : vector<24x16xf32>
    %c1_i32_56 = arith.constant 1 : i32
    %123 = vector.broadcast %c1_i32_56 : i32 to vector<1x4xi32>
    %124 = arith.cmpi eq, %0, %123 : vector<1x4xi32>
    %125 = arith.extui %124 : vector<1x4xi1> to vector<1x4xi32>
    %126 = arith.sitofp %125 : vector<1x4xi32> to vector<1x4xf32>
    %127 = arith.mulf %111, %126 : vector<1x4xf32>
    %cst_57 = arith.constant dense<0.000000e+00> : vector<1xf32>
    %128 = vector.multi_reduction <add>, %127, %cst_57 [1] : vector<1x4xf32> to vector<1xf32>
    %129 = vector.shape_cast %128 : vector<1xf32> to vector<1x1xf32>
    %c0_58 = arith.constant 0 : index
    %c1_59 = arith.constant 1 : index
    %c0_60 = arith.constant 0 : index
    %130 = vector.load %arg1[%c0_58, %c1_59, %c0_60] : memref<24x4x16xf32, #tpu.memory_space<vmem>>, vector<24x1x16xf32>
    %131 = vector.shape_cast %130 : vector<24x1x16xf32> to vector<24x16xf32>
    %132 = vector.broadcast %129 : vector<1x1xf32> to vector<24x16xf32>
    %133 = arith.mulf %132, %131 : vector<24x16xf32>
    %134 = arith.addf %122, %133 : vector<24x16xf32>
    %c2_i32_61 = arith.constant 2 : i32
    %135 = vector.broadcast %c2_i32_61 : i32 to vector<1x4xi32>
    %136 = arith.cmpi eq, %0, %135 : vector<1x4xi32>
    %137 = arith.extui %136 : vector<1x4xi1> to vector<1x4xi32>
    %138 = arith.sitofp %137 : vector<1x4xi32> to vector<1x4xf32>
    %139 = arith.mulf %111, %138 : vector<1x4xf32>
    %cst_62 = arith.constant dense<0.000000e+00> : vector<1xf32>
    %140 = vector.multi_reduction <add>, %139, %cst_62 [1] : vector<1x4xf32> to vector<1xf32>
    %141 = vector.shape_cast %140 : vector<1xf32> to vector<1x1xf32>
    %c0_63 = arith.constant 0 : index
    %c2_64 = arith.constant 2 : index
    %c0_65 = arith.constant 0 : index
    %142 = vector.load %arg1[%c0_63, %c2_64, %c0_65] : memref<24x4x16xf32, #tpu.memory_space<vmem>>, vector<24x1x16xf32>
    %143 = vector.shape_cast %142 : vector<24x1x16xf32> to vector<24x16xf32>
    %144 = vector.broadcast %141 : vector<1x1xf32> to vector<24x16xf32>
    %145 = arith.mulf %144, %143 : vector<24x16xf32>
    %146 = arith.addf %134, %145 : vector<24x16xf32>
    %c3_i32_66 = arith.constant 3 : i32
    %147 = vector.broadcast %c3_i32_66 : i32 to vector<1x4xi32>
    %148 = arith.cmpi eq, %0, %147 : vector<1x4xi32>
    %149 = arith.extui %148 : vector<1x4xi1> to vector<1x4xi32>
    %150 = arith.sitofp %149 : vector<1x4xi32> to vector<1x4xf32>
    %151 = arith.mulf %111, %150 : vector<1x4xf32>
    %cst_67 = arith.constant dense<0.000000e+00> : vector<1xf32>
    %152 = vector.multi_reduction <add>, %151, %cst_67 [1] : vector<1x4xf32> to vector<1xf32>
    %153 = vector.shape_cast %152 : vector<1xf32> to vector<1x1xf32>
    %c0_68 = arith.constant 0 : index
    %c3_69 = arith.constant 3 : index
    %c0_70 = arith.constant 0 : index
    %154 = vector.load %arg1[%c0_68, %c3_69, %c0_70] : memref<24x4x16xf32, #tpu.memory_space<vmem>>, vector<24x1x16xf32>
    %155 = vector.shape_cast %154 : vector<24x1x16xf32> to vector<24x16xf32>
    %156 = vector.broadcast %153 : vector<1x1xf32> to vector<24x16xf32>
    %157 = arith.mulf %156, %155 : vector<24x16xf32>
    %158 = arith.addf %146, %157 : vector<24x16xf32>
    %c0_71 = arith.constant 0 : index
    %c0_72 = arith.constant 0 : index
    %159 = vector.load %arg5[%c0_71, %c0_72] : memref<24x16xf32, #tpu.memory_space<vmem>>, vector<24x16xf32>
    tpu.vector_store %arg5[%c0_71, %c0_72], %158 {strides = array<i32>} : memref<24x16xf32, #tpu.memory_space<vmem>>, vector<24x16xf32>,
    return
  }
  func.func @transform_0(%arg0: i32) -> (i32, i32, i32) {
    %c0_i32 = arith.constant 0 : i32
    %c0_i32_0 = arith.constant 0 : i32
    %c0_i32_1 = arith.constant 0 : i32
    %c0_i32_2 = arith.constant 0 : i32
    return %c0_i32, %c0_i32_0, %c0_i32_1 : i32, i32, i32
  }
  func.func @transform_1(%arg0: i32) -> (i32, i32) {
    %c0_i32 = arith.constant 0 : i32
    %c0_i32_0 = arith.constant 0 : i32
    %c0_i32_1 = arith.constant 0 : i32
    return %c0_i32, %c0_i32_0 : i32, i32
  }
  func.func @transform_2(%arg0: i32) -> (i32, i32) {
    %c0_i32 = arith.constant 0 : i32
    %c0_i32_0 = arith.constant 0 : i32
    %c0_i32_1 = arith.constant 0 : i32
    return %c0_i32, %c0_i32_0 : i32, i32
  }
  func.func @transform_3(%arg0: i32) -> (i32, i32) {
    %c0_i32 = arith.constant 0 : i32
    %c0_i32_0 = arith.constant 0 : i32
    %c0_i32_1 = arith.constant 0 : i32
    return %c0_i32, %c0_i32_0 : i32, i32
  }
  func.func @transform_4(%arg0: i32) -> (i32, i32) {
    %c0_i32 = arith.constant 0 : i32
    %c0_i32_0 = arith.constant 0 : i32
    %c0_i32_1 = arith.constant 0 : i32
    return %c0_i32, %c0_i32_0 : i32, i32
  }
}

</mosaic_0001>

<bundles_post_ra>
// kernel: tpu_custom_call.1
= control target key start
LH: loop header
LB: loop body
LE: loop exit
PB: predicated region body
PF: predicated region fallthrough
CT: control target
= control target key end

     0   :  { %9 = vsyncpa [#allocation3], 0  ;;  %s2170_s0 = inlined_call_operand.hbm [shape: f32[24,4,16], index: 0, kind: input, shape index: {}]   ;;  %s2171_s1 = inlined_call_operand.hbm [shape: f32[16,32], index: 1, kind: input, shape index: {}]   ;;  %s2172_s2 = inlined_call_operand.hbm [shape: f32[1,32], index: 2, kind: input, shape index: {}]   ;;  %s2173_s3 = inlined_call_operand.hbm [shape: f32[1,32], index: 3, kind: input, shape index: {}]   ;;  %s2174_s4 = inlined_call_operand.hbm [shape: f32[24,16], index: 4, kind: output, shape index: {}]  }
   0x1   :  { %10 = vsyncpa [#allocation6], 0 }
   0x2   :  { %11 = vsyncpa [#allocation9], 0 }
   0x3   :  { %12 = vsyncpa [#allocation4], 0  ;;  %s1479_s15 = smov [#allocation5]   ;;  %s1361_s19 = scalar_lea.hbm %s2171_s1, 256 }
   0x4   :  { %s30_s16 = sshll.u32 %s1479_s15, 4  ;;  %p1362_p0 = scmp.ne.s32.totalorder %s2171_s1, %s1361_s19  ;;  %s31_s16 = int_to_ptr.vmem [resolvable:$true] %s30_s16 }
   0x5   :  { %p1365_p1 = scmp.lt.u32.totalorder %s1361_s19, %s2171_s1 }
   0x7   :  { %p1367_p2 = pnand %p1365_p1, %p1362_p0 }
   0x9   :  { %1370 = shalt.err (!%p1367_p2)
}
   0xa   :  { %s1371_s24 = scalar_lea.vmem %s31_s16, 256  ;;  %p1376_p4 = scmp.lt.s32.totalorder %s31_s16, %s31_s16 }
   0xb   :  { %p1372_p3 = scmp.ne.s32.totalorder %s31_s16, %s1371_s24  ;;  %p1377_p5 = scmp.lt.s32.totalorder %s1371_s24, %s1371_s24 }
   0xd   :  { %p1378_p6 = por %p1377_p5, %p1376_p4 }
   0xf   :  { %p1379_p7 = pnand %p1378_p6, %p1372_p3 }
  0x11   :  { %1382 = shalt.err (!%p1379_p7)
}
  0x12   :  { %s1480_s25 = smov 128   ;;  %s1481_s26 = smov 8  }
  0x13   :  { %36 = dma.hbm_to_vmem [thread:$0]  %s2171_s1, 256, %s31_s16, [#allocation6], %s1480_s25, %s1480_s25, %s1481_s26  }
  0x14   :  { %s1482_s29 = smov [#allocation2]   ;;  %s1383_s7 = scalar_lea.hbm %s2170_s0, 1536 }
  0x15   :  { %s18_s30 = sshll.u32 %s1482_s29, 4  ;;  %p1384_p8 = scmp.ne.s32.totalorder %s2170_s0, %s1383_s7  ;;  %s19_s30 = int_to_ptr.vmem [resolvable:$true] %s18_s30 }
  0x16   :  { %p1387_p9 = scmp.lt.u32.totalorder %s1383_s7, %s2170_s0 }
  0x18   :  { %p1389_p10 = pnand %p1387_p9, %p1384_p8 }
  0x1a   :  { %1392 = shalt.err (!%p1389_p10)
}
  0x1b   :  { %s1393_s12 = scalar_lea.vmem %s19_s30, 1536  ;;  %p1398_p12 = scmp.lt.s32.totalorder %s19_s30, %s19_s30 }
  0x1c   :  { %p1394_p11 = scmp.ne.s32.totalorder %s19_s30, %s1393_s12  ;;  %p1399_p13 = scmp.lt.s32.totalorder %s1393_s12, %s1393_s12 }
  0x1e   :  { %p1400_p0 = por %p1399_p13, %p1398_p12 }
  0x20   :  { %p1401_p1 = pnand %p1400_p0, %p1394_p11 }
  0x22   :  { %1404 = shalt.err (!%p1401_p1)
}
  0x23   :  { %s1483_s1 = smov 64   ;;  %s1484_s13 = smov 4  }
  0x24   :  { %24 = dma.hbm_to_vmem [thread:$0]  %s2170_s0, 1536, %s19_s30, [#allocation3], %s1483_s1, %s1483_s1, %s1484_s13  }
  0x25   :  { %s1485_s16 = smov [#allocation7]   ;;  %s1486_s18 = smov [#allocation8]  }
  0x26   :  { %s43_s17 = sshll.u32 %s1485_s16, 4  ;;  %s53_s19 = sshll.u32 %s1486_s18, 4  ;;  %s44_s17 = int_to_ptr.vmem [resolvable:$true] %s43_s17  ;;  %s54_s19 = int_to_ptr.vmem [resolvable:$true] %s53_s19 }
  0x27   :  { %s1405_s22 = scalar_lea.hbm %s2172_s2, 16 }
  0x28   :  { %p1406_p2 = scmp.ne.s32.totalorder %s2172_s2, %s1405_s22  ;;  %p1409_p3 = scmp.lt.u32.totalorder %s1405_s22, %s2172_s2 }
  0x2a   :  { %p1411_p4 = pnand %p1409_p3, %p1406_p2 }
  0x2c   :  { %1414 = shalt.err (!%p1411_p4)
}
  0x2d   :  { %s1415_s0 = scalar_lea.vmem %s44_s17, 16  ;;  %s1419_s29 = scalar_lea.vmem %s44_s17, 32 }
  0x2e   :  { %p1416_p5 = scmp.ne.s32.totalorder %s44_s17, %s1415_s0  ;;  %p1420_p6 = scmp.lt.s32.totalorder %s44_s17, %s44_s17 }
  0x2f   :  { %p1421_p7 = scmp.lt.s32.totalorder %s1419_s29, %s1415_s0 }
  0x31   :  { %p1422_p8 = por %p1421_p7, %p1420_p6 }
  0x33   :  { %p1423_p9 = pnand %p1422_p8, %p1416_p5 }
  0x35   :  { %1426 = shalt.err (!%p1423_p9)
}
  0x36   :  { %46 = dma.hbm_to_vmem [thread:$0]  %s2172_s2, 16, %s44_s17, [#allocation6]  }
  0x37   :  { %s1427_s8 = scalar_lea.hbm %s2173_s3, 16 }
  0x38   :  { %p1428_p10 = scmp.ne.s32.totalorder %s2173_s3, %s1427_s8  ;;  %p1431_p11 = scmp.lt.u32.totalorder %s1427_s8, %s2173_s3 }
  0x3a   :  { %p1433_p12 = pnand %p1431_p11, %p1428_p10 }
  0x3c   :  { %1436 = shalt.err (!%p1433_p12)
}
  0x3d   :  { %s1437_s1 = scalar_lea.vmem %s54_s19, 16  ;;  %s1441_s13 = scalar_lea.vmem %s54_s19, 32 }
  0x3e   :  { %p1438_p13 = scmp.ne.s32.totalorder %s54_s19, %s1437_s1  ;;  %p1442_p0 = scmp.lt.s32.totalorder %s54_s19, %s54_s19 }
  0x3f   :  { %p1443_p1 = scmp.lt.s32.totalorder %s1441_s13, %s1437_s1 }
  0x41   :  { %p1444_p2 = por %p1443_p1, %p1442_p0 }
  0x43   :  { %p1445_p3 = pnand %p1444_p2, %p1438_p13 }
  0x45   :  { %1448 = shalt.err (!%p1445_p3)
}
  0x46   :  { %56 = dma.hbm_to_vmem [thread:$0]  %s2173_s3, 16, %s54_s19, [#allocation9]  }
  0x47   :  { %1471 = dma.done.wait [#allocation3], 1536  }
  0x48   :  { %1472 = vsyncadd [#allocation3], 4294965760 }
  0x49   :  { %1473 = dma.done.wait [#allocation6], 272  }
  0x4a   :  { %1474 = vsyncadd [#allocation6], 4294967024 }
  0x4b   :  { %1475 = dma.done.wait [#allocation9], 16  }
  0x4c   :  { %1476 = vsyncadd [#allocation9], 4294967280  ;;  %v1487_v0 = vmov 0.0|0.0   ;;  %vm1488_vm0 = vmmov 0   ;;  %v2179_v1 = vmov 0.0   ;;  %vm136_vm1 = vcmask 1041409  }
  0x4d   :  { %1309 = vmatprep.subr.bf16.mxu0 %v1487_v0  ;;  %1312 = vmatprep.subr.bf16.mxu1 %v1487_v0  ;;  %vm139_vm2 = vcmask 1042434   ;;  %vm142_vm3 = vcmask 1043459   ;;  %vm145_vm4 = vcmask 1044484   ;;  %v102_v2 = vld [vmem:[#allocation5] sm:$0xff]  ;;  %v103_v3 = vld [vmem:[#allocation5 + $0x8] sm:$0xff]  ;;  %vm148_vm5 = vcmask 1045509  }
  0x4e   :  { %1261 = vmatprep.mubr.msk.f32.mxu0 %vm1488_vm0, %v2179_v1  ;;  %1274 = vmatprep.mubr.msk.f32.mxu1 %vm1488_vm0, %v2179_v1  ;;  %v1571_v4 = vld [vmem:[#allocation2] sm:$0x1]  ;;  %vm151_vm6 = vcmask 1046534   ;;  %v1573_v5 = vpack.c.bf16 %v103_v3, %v102_v2  ;;  %v1575_v6 = vld [vmem:[#allocation2 + $0x4] sm:$0x1]  ;;  %vm154_vm7 = vcmask 1047559  }
  0x4f   :  { %v1577_v7 = vld [vmem:[#allocation2 + $0x8] sm:$0x1]  ;;  %v1579_v8 = vld [vmem:[#allocation2 + $0xc] sm:$0x1]  ;;  %v1581_v9 = vld [vmem:[#allocation2 + $0x10] sm:$0x1] }
  0x50   :  { %v1583_v10 = vld [vmem:[#allocation2 + $0x14] sm:$0x1]  ;;  %v1585_v11 = vld [vmem:[#allocation2 + $0x18] sm:$0x1]  ;;  %1311 = vmatpush3.bf16.msra.mxu0 %v1573_v5  ;;  %1314 = vmatpush3.bf16.msra.mxu1 %v1573_v5  ;;  %v1589_v12 = vld [vmem:[#allocation2 + $0x1c] sm:$0x1] }
  0x51   :  { %v135_v13 = vrot.slane %v1575_v6, 7  ;;  %v138_v14 = vrot.slane %v1577_v7, 6  ;;  %v141_v15 = vrot.slane %v1579_v8, 5  ;;  %1315 = vmatprep.subr.bf16.mxu0 %v1487_v0  ;;  %v144_v16 = vrot.slane %v1581_v9, 4  ;;  %v1598_v20 = vld [vmem:[#allocation2 + $0x1] sm:$0x1]  ;;  %1318 = vmatprep.subr.bf16.mxu1 %v1487_v0 }
  0x52   :  { %v147_v17 = vrot.slane %v1583_v10, 3  ;;  %v150_v18 = vrot.slane %v1585_v11, 2  ;;  %v153_v19 = vrot.slane %v1589_v12, 1  ;;  %v1602_v22 = vld [vmem:[#allocation2 + $0x5] sm:$0x1]  ;;  %vm184_vm8 = vcmask 130048  }
  0x53   :  { %v137_v21 = vsel %vm136_vm1, %v135_v13, %v1571_v4  ;;  %v1604_v23 = vld [vmem:[#allocation2 + $0x9] sm:$0x1]  ;;  %v1606_v24 = vld [vmem:[#allocation2 + $0xd] sm:$0x1]  ;;  %v1609_v26 = vld [vmem:[#allocation2 + $0x11] sm:$0x1] }
  0x54   :  { %v140_v25 = vsel %vm139_vm2, %v138_v14, %v137_v21  ;;  %v1611_v27 = vld [vmem:[#allocation2 + $0x15] sm:$0x1]  ;;  %v1613_v28 = vld [vmem:[#allocation2 + $0x19] sm:$0x1]  ;;  %v1616_v30 = vld [vmem:[#allocation2 + $0x1d] sm:$0x1] }
  0x55   :  { %v143_v29 = vsel %vm142_vm3, %v141_v15, %v140_v25  ;;  %v358_v31 = vrot.slane %v1602_v22, 7  ;;  %v360_v32 = vrot.slane %v1604_v23, 6  ;;  %v362_v33 = vrot.slane %v1606_v24, 5  ;;  %v1624_v37 = vld [vmem:[#allocation2 + $0x20] sm:$0x1]  ;;  %s1490_s3 = smov [#allocation10]  }
  0x56   :  { %v146_v34 = vsel %vm145_vm4, %v144_v16, %v143_v29  ;;  %v364_v35 = vrot.slane %v1609_v26, 4  ;;  %v366_v36 = vrot.slane %v1611_v27, 3  ;;  %v368_v40 = vrot.slane %v1613_v28, 2  ;;  %v1631_v42 = vld [vmem:[#allocation2 + $0x24] sm:$0x1]  ;;  %s1205_s15 = sshll.u32 %s1490_s3, 4  ;;  %s1206_s15 = int_to_ptr.vmem [resolvable:$true] %s1205_s15 }
  0x57   :  { %v149_v38 = vsel %vm148_vm5, %v147_v17, %v146_v34  ;;  %v359_v39 = vsel %vm136_vm1, %v358_v31, %v1598_v20  ;;  %v370_v41 = vrot.slane %v1616_v30, 1  ;;  %v1633_v43 = vld [vmem:[#allocation2 + $0x28] sm:$0x1]  ;;  %v1637_v46 = vld [vmem:[#allocation2 + $0x2c] sm:$0x1]  ;;  %v156_v53 = vrot.slane %v1631_v42, 7  ;;  %p1454_p5 = scmp.lt.s32.totalorder %s1206_s15, %s1206_s15 }
  0x58   :  { %v152_v44 = vsel %vm151_vm6, %v150_v18, %v149_v38  ;;  %v361_v45 = vsel %vm139_vm2, %v360_v32, %v359_v39  ;;  %v1639_v47 = vld [vmem:[#allocation2 + $0x30] sm:$0x1]  ;;  %v1641_v48 = vld [vmem:[#allocation2 + $0x34] sm:$0x1]  ;;  %v1645_v51 = vld [vmem:[#allocation2 + $0x38] sm:$0x1] }
  0x59   :  { %v155_v49 = vsel %vm154_vm7, %v153_v19, %v152_v44  ;;  %v363_v50 = vsel %vm142_vm3, %v362_v33, %v361_v45  ;;  %v1647_v52 = vld [vmem:[#allocation2 + $0x3c] sm:$0x1]  ;;  %v158_v54 = vrot.slane %v1633_v43, 6  ;;  %v160_v56 = vrot.slane %v1637_v46, 5  ;;  %v1656_v59 = vld [vmem:[#allocation2 + $0x21] sm:$0x1] }
  0x5a   :  { %1262 = vmatmul.mubr.msk.f32.vlgmr.msra.gmra.mrb[0].mxu0 %vm184_vm8, %v155_v49  ;;  %v365_v55 = vsel %vm145_vm4, %v364_v35, %v363_v50  ;;  %v162_v57 = vrot.slane %v1639_v47, 4  ;;  %v164_v58 = vrot.slane %v1641_v48, 3  ;;  %v157_v61 = vsel %vm136_vm1, %v156_v53, %v1624_v37  ;;  %v1666_v0 = vld [vmem:[#allocation2 + $0x25] sm:$0x1]  ;;  %v1668_v2 = vld [vmem:[#allocation2 + $0x29] sm:$0x1] }
  0x5b   :  { %v367_v60 = vsel %vm148_vm5, %v366_v36, %v365_v55  ;;  %1317 = vmatpush3.bf16.msra.mxu0 %v1573_v5  ;;  %1264 = vmatprep.mubr.msk.f32.mxu0 %vm1488_vm0, %v2179_v1  ;;  %v166_v62 = vrot.slane %v1645_v51, 2  ;;  %v168_v63 = vrot.slane %v1647_v52, 1  ;;  %v159_v13 = vsel %vm139_vm2, %v158_v54, %v157_v61  ;;  %v1672_v14 = vld [vmem:[#allocation2 + $0x2d] sm:$0x1]  ;;  %v1674_v15 = vld [vmem:[#allocation2 + $0x31] sm:$0x1] }
  0x5c   :  { %v369_v3 = vsel %vm151_vm6, %v368_v40, %v367_v60  ;;  %2237 = vst [vmem:[#allocation15_spill] sm:$0xff] %v1674_v15  ;;  %v1676_v16 = vld [vmem:[#allocation2 + $0x35] sm:$0x1]  ;;  %v161_v18 = vsel %vm142_vm3, %v160_v56, %v159_v13  ;;  %v1680_v19 = vld [vmem:[#allocation2 + $0x39] sm:$0x1]  ;;  %v372_v25 = vrot.slane %v1666_v0, 7 }
  0x5d   :  { %2238 = vst [vmem:[#allocation16_spill] sm:$0xff] %v1676_v16  ;;  %v371_v17 = vsel %vm154_vm7, %v370_v41, %v369_v3  ;;  %2239 = vst [vmem:[#allocation17_spill] sm:$0xff] %v1680_v19  ;;  %v1682_v21 = vld [vmem:[#allocation2 + $0x3d] sm:$0x1]  ;;  %v374_v29 = vrot.slane %v1668_v2, 6  ;;  %v163_v31 = vsel %vm145_vm4, %v162_v57, %v161_v18  ;;  %v376_v32 = vrot.slane %v1672_v14, 5 }
  0x5e   :  { %2240 = vst [vmem:[#allocation18_spill] sm:$0xff] %v1682_v21  ;;  %1275 = vmatmul.mubr.msk.f32.vlgmr.msra.gmra.mrb[0].mxu1 %vm184_vm8, %v371_v17  ;;  %v378_v33 = vrot.slane %v1674_v15, 4  ;;  %v380_v34 = vrot.slane %v1676_v16, 3  ;;  %v1691_v35 = vld [vmem:[#allocation2 + $0x40] sm:$0x1]  ;;  %v165_v36 = vsel %vm148_vm5, %v164_v58, %v163_v31  ;;  %v373_v38 = vsel %vm136_vm1, %v372_v25, %v1656_v59  ;;  %s1449_s16 = scalar_lea.vmem %s1206_s15, 384 }
  0x5f   :  { %1277 = vmatprep.mubr.msk.f32.mxu1 %vm1488_vm0, %v2179_v1  ;;  %v382_v39 = vrot.slane %v1680_v19, 2  ;;  %v384_v40 = vrot.slane %v1682_v21, 1  ;;  %1320 = vmatpush3.bf16.msra.mxu1 %v1573_v5  ;;  %v1701_v41 = vld [vmem:[#allocation2 + $0x44] sm:$0x1]  ;;  %v1703_v44 = vld [vmem:[#allocation2 + $0x48] sm:$0x1]  ;;  %v167_v45 = vsel %vm151_vm6, %v166_v62, %v165_v36  ;;  %v375_v49 = vsel %vm139_vm2, %v374_v29, %v373_v38  ;;  %p1450_p4 = scmp.ne.s32.totalorder %s1206_s15, %s1449_s16  ;;  %p1455_p6 = scmp.lt.s32.totalorder %s1449_s16, %s1449_s16 }
  0x60   :  { %v1707_v50 = vld [vmem:[#allocation2 + $0x4c] sm:$0x1]  ;;  %v1709_v53 = vld [vmem:[#allocation2 + $0x50] sm:$0x1]  ;;  %v1711_v54 = vld [vmem:[#allocation2 + $0x54] sm:$0x1]  ;;  %v169_v55 = vsel %vm154_vm7, %v168_v63, %v167_v45  ;;  %v377_v56 = vsel %vm142_vm3, %v376_v32, %v375_v49 }
  0x61   :  { %v1715_v57 = vld [vmem:[#allocation2 + $0x58] sm:$0x1]  ;;  %v1717_v5 = vld [vmem:[#allocation2 + $0x5c] sm:$0x1]  ;;  %v170_v58 = vrot.slane %v1701_v41, 7  ;;  %v172_v60 = vrot.slane %v1703_v44, 6  ;;  %1265 = vmatmul.mubr.msk.f32.gmra.mrb[2].mxu0 %vm184_vm8, %v169_v55  ;;  %v379_v61 = vsel %vm145_vm4, %v378_v33, %v377_v56  ;;  %p1456_p7 = por %p1455_p6, %p1454_p5 }
  0x62   :  { %v174_v62 = vrot.slane %v1707_v50, 5  ;;  %v176_v3 = vrot.slane %v1709_v53, 4  ;;  %v178_v63 = vrot.slane %v1711_v54, 3  ;;  %v1726_v13 = vld [vmem:[#allocation2 + $0x41] sm:$0x1]  ;;  %v381_v17 = vsel %vm148_vm5, %v380_v34, %v379_v61  ;;  %1267 = vmatprep.mubr.msk.f32.mxu0 %vm1488_vm0, %v2179_v1 }
  0x63   :  { %2241 = vst [vmem:[#allocation19_spill] sm:$0xff] %v1726_v13  ;;  %v171_v18 = vsel %vm136_vm1, %v170_v58, %v1691_v35  ;;  %v180_v25 = vrot.slane %v1715_v57, 2  ;;  %v182_v29 = vrot.slane %v1717_v5, 1  ;;  %v1735_v31 = vld [vmem:[#allocation2 + $0x45] sm:$0x1]  ;;  %v383_v33 = vsel %vm151_vm6, %v382_v39, %v381_v17  ;;  %p1457_p8 = pnand %p1456_p7, %p1450_p4 }
  0x64   :  { %2242 = vst [vmem:[#allocation20_spill] sm:$0xff] %v1735_v31  ;;  %v1737_v32 = vld [vmem:[#allocation2 + $0x49] sm:$0x1]  ;;  %v173_v36 = vsel %vm139_vm2, %v172_v60, %v171_v18  ;;  %v1741_v38 = vld [vmem:[#allocation2 + $0x4d] sm:$0x1]  ;;  %v385_v49 = vsel %vm154_vm7, %v384_v40, %v383_v33  ;;  %v386_v61 = vrot.slane %v1735_v31, 7 }
  0x65   :  { %2243 = vst [vmem:[#allocation21_spill] sm:$0xff] %v1737_v32  ;;  %2244 = vst [vmem:[#allocation22_spill] sm:$0xff] %v1741_v38  ;;  %v1743_v34 = vld [vmem:[#allocation2 + $0x51] sm:$0x1]  ;;  %v1745_v45 = vld [vmem:[#allocation2 + $0x55] sm:$0x1]  ;;  %v175_v55 = vsel %vm142_vm3, %v174_v62, %v173_v36  ;;  %1278 = vmatmul.mubr.msk.f32.gmra.mrb[2].mxu1 %vm184_vm8, %v385_v49 }
  0x66   :  { %2245 = vst [vmem:[#allocation23_spill] sm:$0xff] %v1743_v34  ;;  %2246 = vst [vmem:[#allocation24_spill] sm:$0xff] %v1745_v45  ;;  %v1749_v56 = vld [vmem:[#allocation2 + $0x59] sm:$0x1]  ;;  %v1751_v58 = vld [vmem:[#allocation2 + $0x5d] sm:$0x1]  ;;  %v177_v60 = vsel %vm145_vm4, %v176_v3, %v175_v55  ;;  %1280 = vmatprep.mubr.msk.f32.mxu1 %vm1488_vm0, %v2179_v1  ;;  %v387_v36 = vsel %vm136_vm1, %v386_v61, %v1726_v13 }
  0x67   :  { %2247 = vst [vmem:[#allocation25_spill] sm:$0xff] %v1749_v56  ;;  %2248 = vst [vmem:[#allocation26_spill] sm:$0xff] %v1751_v58  ;;  %v388_v39 = vrot.slane %v1737_v32, 6  ;;  %v390_v17 = vrot.slane %v1741_v38, 5  ;;  %v392_v18 = vrot.slane %v1743_v34, 4  ;;  %v394_v40 = vrot.slane %v1745_v45, 3 }
  0x68   :  { %v1760_v33 = vld [vmem:[#allocation2 + $0x2] sm:$0x1]  ;;  %v179_v62 = vsel %vm148_vm5, %v178_v63, %v177_v60  ;;  %v396_v49 = vrot.slane %v1749_v56, 2  ;;  %v398_v3 = vrot.slane %v1751_v58, 1  ;;  %v1769_v55 = vld [vmem:[#allocation2 + $0x6] sm:$0x1] }
  0x69   :  { %2249 = vst [vmem:[#allocation27_spill] sm:$0xff] %v1760_v33  ;;  %2250 = vst [vmem:[#allocation28_spill] sm:$0xff] %v1769_v55  ;;  %v1771_v38 = vld [vmem:[#allocation2 + $0xa] sm:$0x1]  ;;  %v181_v45 = vsel %vm151_vm6, %v180_v25, %v179_v62  ;;  %v389_v34 = vsel %vm139_vm2, %v388_v39, %v387_v36  ;;  %v1775_v32 = vld [vmem:[#allocation2 + $0xe] sm:$0x1] }
  0x6a   :  { %2251 = vst [vmem:[#allocation29_spill] sm:$0xff] %v1771_v38  ;;  %2252 = vst [vmem:[#allocation30_spill] sm:$0xff] %v1775_v32  ;;  %v1777_v1 = vld [vmem:[#allocation2 + $0x12] sm:$0x1]  ;;  %v1779_v63 = vld [vmem:[#allocation2 + $0x16] sm:$0x1]  ;;  %v183_v61 = vsel %vm154_vm7, %v182_v29, %v181_v45  ;;  %v391_v60 = vsel %vm142_vm3, %v390_v17, %v389_v34 }
  0x6b   :  { %2253 = vst [vmem:[#allocation31_spill] sm:$0xff] %v1777_v1  ;;  %2254 = vst [vmem:[#allocation32_spill] sm:$0xff] %v1779_v63  ;;  %v1783_v56 = vld [vmem:[#allocation2 + $0x1a] sm:$0x1]  ;;  %v1785_v58 = vld [vmem:[#allocation2 + $0x1e] sm:$0x1]  ;;  %1268 = vmatmul.mubr.msk.f32.gmra.mrb[4].mxu0 %vm184_vm8, %v183_v61  ;;  %v393_v39 = vsel %vm145_vm4, %v392_v18, %v391_v60 }
  0x6c   :  { %2255 = vst [vmem:[#allocation33_spill] sm:$0xff] %v1783_v56  ;;  %2256 = vst [vmem:[#allocation34_spill] sm:$0xff] %v1785_v58  ;;  %v565_v31 = vrot.slane %v1769_v55, 7  ;;  %v567_v25 = vrot.slane %v1771_v38, 6  ;;  %v569_v62 = vrot.slane %v1775_v32, 5  ;;  %v571_v36 = vrot.slane %v1777_v1, 4 }
  0x6d   :  { %v573_v29 = vrot.slane %v1779_v63, 3  ;;  %v1794_v45 = vld [vmem:[#allocation2 + $0x3] sm:$0x1]  ;;  %v395_v34 = vsel %vm148_vm5, %v394_v40, %v393_v39  ;;  %v2258_v17 = vmov 0.0   ;;  %v575_v61 = vrot.slane %v1783_v56, 2 }
  0x6e   :  { %2257 = vst [vmem:[#allocation35_spill] sm:$0xff] %v1794_v45  ;;  %1287 = vmatprep.mubr.msk.f32.mxu0 %vm1488_vm0, %v2258_v17  ;;  %v566_v38 = vsel %vm136_vm1, %v565_v31, %v1760_v33  ;;  %v577_v18 = vrot.slane %v1785_v58, 1  ;;  %v1803_v60 = vld [vmem:[#allocation2 + $0x7] sm:$0x1]  ;;  %v1805_v32 = vld [vmem:[#allocation2 + $0xb] sm:$0x1]  ;;  %v397_v63 = vsel %vm151_vm6, %v396_v49, %v395_v34 }
  0x6f   :  { %2259 = vst [vmem:[#allocation36_spill] sm:$0xff] %v1803_v60  ;;  %2260 = vst [vmem:[#allocation37_spill] sm:$0xff] %v1805_v32  ;;  %v568_v1 = vsel %vm139_vm2, %v567_v25, %v566_v38  ;;  %v1809_v55 = vld [vmem:[#allocation2 + $0xf] sm:$0x1]  ;;  %v1811_v40 = vld [vmem:[#allocation2 + $0x13] sm:$0x1]  ;;  %v399_v31 = vsel %vm154_vm7, %v398_v3, %v397_v63 }
  0x70   :  { %2261 = vst [vmem:[#allocation38_spill] sm:$0xff] %v1809_v55  ;;  %2262 = vst [vmem:[#allocation39_spill] sm:$0xff] %v1811_v40  ;;  %v1813_v39 = vld [vmem:[#allocation2 + $0x17] sm:$0x1]  ;;  %v570_v56 = vsel %vm142_vm3, %v569_v62, %v568_v1  ;;  %v1817_v33 = vld [vmem:[#allocation2 + $0x1b] sm:$0x1]  ;;  %1281 = vmatmul.mubr.msk.f32.gmra.mrb[4].mxu1 %vm184_vm8, %v399_v31 }
  0x71   :  { %2263 = vst [vmem:[#allocation40_spill] sm:$0xff] %v1813_v39  ;;  %2264 = vst [vmem:[#allocation41_spill] sm:$0xff] %v1817_v33  ;;  %v1819_v58 = vld [vmem:[#allocation2 + $0x1f] sm:$0x1]  ;;  %v772_v13 = vrot.slane %v1803_v60, 7  ;;  %v774_v49 = vrot.slane %v1805_v32, 6  ;;  %v572_v38 = vsel %vm145_vm4, %v571_v36, %v570_v56  ;;  %1300 = vmatprep.mubr.msk.f32.mxu1 %vm1488_vm0, %v2258_v17 }
  0x72   :  { %2265 = vst [vmem:[#allocation42_spill] sm:$0xff] %v1819_v58  ;;  %v776_v25 = vrot.slane %v1809_v55, 5  ;;  %v778_v34 = vrot.slane %v1811_v40, 4  ;;  %v780_v3 = vrot.slane %v1813_v39, 3  ;;  %v1828_v63 = vld [vmem:[#allocation2 + $0x22] sm:$0x1]  ;;  %v574_v1 = vsel %vm148_vm5, %v573_v29, %v572_v38 }
  0x73   :  { %2266 = vst [vmem:[#allocation43_spill] sm:$0xff] %v1828_v63  ;;  %v773_v62 = vsel %vm136_vm1, %v772_v13, %v1794_v45  ;;  %v782_v31 = vrot.slane %v1817_v33, 2  ;;  %v784_v56 = vrot.slane %v1819_v58, 1  ;;  %v1837_v36 = vld [vmem:[#allocation2 + $0x26] sm:$0x1]  ;;  %v576_v39 = vsel %vm151_vm6, %v575_v61, %v574_v1 }
  0x74   :  { %2267 = vst [vmem:[#allocation44_spill] sm:$0xff] %v1837_v36  ;;  %v1839_v55 = vld [vmem:[#allocation2 + $0x2a] sm:$0x1]  ;;  %v775_v40 = vsel %vm139_vm2, %v774_v49, %v773_v62  ;;  %v1843_v32 = vld [vmem:[#allocation2 + $0x2e] sm:$0x1]  ;;  %v578_v13 = vsel %vm154_vm7, %v577_v18, %v576_v39  ;;  %v579_v45 = vrot.slane %v1837_v36, 7 }
  0x75   :  { %2268 = vst [vmem:[#allocation45_spill] sm:$0xff] %v1839_v55  ;;  %2269 = vst [vmem:[#allocation46_spill] sm:$0xff] %v1843_v32  ;;  %v1845_v60 = vld [vmem:[#allocation2 + $0x32] sm:$0x1]  ;;  %v1847_v29 = vld [vmem:[#allocation2 + $0x36] sm:$0x1]  ;;  %v777_v38 = vsel %vm142_vm3, %v776_v25, %v775_v40  ;;  %1288 = vmatmul.mubr.msk.f32.vlgmr.msra.gmra.mrb[6].mxu0 %vm184_vm8, %v578_v13 }
  0x76   :  { %2270 = vst [vmem:[#allocation47_spill] sm:$0xff] %v1845_v60  ;;  %2271 = vst [vmem:[#allocation48_spill] sm:$0xff] %v1847_v29  ;;  %v1851_v33 = vld [vmem:[#allocation2 + $0x3a] sm:$0x1]  ;;  %v1853_v58 = vld [vmem:[#allocation2 + $0x3e] sm:$0x1]  ;;  %v779_v49 = vsel %vm145_vm4, %v778_v34, %v777_v38  ;;  %1290 = vmatprep.mubr.msk.f32.mxu0 %vm1488_vm0, %v2258_v17  ;;  %v580_v25 = vsel %vm136_vm1, %v579_v45, %v1828_v63 }
  0x77   :  { %2272 = vst [vmem:[#allocation49_spill] sm:$0xff] %v1851_v33  ;;  %2273 = vst [vmem:[#allocation50_spill] sm:$0xff] %v1853_v58  ;;  %v581_v61 = vrot.slane %v1839_v55, 6  ;;  %v583_v1 = vrot.slane %v1843_v32, 5  ;;  %v585_v62 = vrot.slane %v1845_v60, 4  ;;  %v587_v18 = vrot.slane %v1847_v29, 3 }
  0x78   :  { %v1862_v39 = vld [vmem:[#allocation2 + $0x42] sm:$0x1]  ;;  %v781_v40 = vsel %vm148_vm5, %v780_v3, %v779_v49  ;;  %v589_v13 = vrot.slane %v1851_v33, 2  ;;  %v591_v34 = vrot.slane %v1853_v58, 1  ;;  %v1871_v38 = vld [vmem:[#allocation2 + $0x46] sm:$0x1] }
  0x79   :  { %2274 = vst [vmem:[#allocation51_spill] sm:$0xff] %v1862_v39  ;;  %2275 = vst [vmem:[#allocation52_spill] sm:$0xff] %v1871_v38  ;;  %v1873_v32 = vld [vmem:[#allocation2 + $0x4a] sm:$0x1]  ;;  %v783_v29 = vsel %vm151_vm6, %v782_v31, %v781_v40  ;;  %v582_v60 = vsel %vm139_vm2, %v581_v61, %v580_v25  ;;  %v1877_v55 = vld [vmem:[#allocation2 + $0x4e] sm:$0x1] }
  0x7a   :  { %2276 = vst [vmem:[#allocation53_spill] sm:$0xff] %v1873_v32  ;;  %2277 = vst [vmem:[#allocation54_spill] sm:$0xff] %v1877_v55  ;;  %v1879_v3 = vld [vmem:[#allocation2 + $0x52] sm:$0x1]  ;;  %v1881_v49 = vld [vmem:[#allocation2 + $0x56] sm:$0x1]  ;;  %v785_v45 = vsel %vm154_vm7, %v784_v56, %v783_v29  ;;  %v584_v33 = vsel %vm142_vm3, %v583_v1, %v582_v60 }
  0x7b   :  { %2278 = vst [vmem:[#allocation55_spill] sm:$0xff] %v1879_v3  ;;  %2279 = vst [vmem:[#allocation56_spill] sm:$0xff] %v1881_v49  ;;  %v1885_v36 = vld [vmem:[#allocation2 + $0x5a] sm:$0x1]  ;;  %v1887_v58 = vld [vmem:[#allocation2 + $0x5e] sm:$0x1]  ;;  %1301 = vmatmul.mubr.msk.f32.vlgmr.msra.gmra.mrb[6].mxu1 %vm184_vm8, %v785_v45  ;;  %v586_v61 = vsel %vm145_vm4, %v585_v62, %v584_v33 }
  0x7c   :  { %2280 = vst [vmem:[#allocation57_spill] sm:$0xff] %v1885_v36  ;;  %2281 = vst [vmem:[#allocation58_spill] sm:$0xff] %v1887_v58  ;;  %v593_v63 = vrot.slane %v1871_v38, 7  ;;  %v595_v31 = vrot.slane %v1873_v32, 6  ;;  %v597_v40 = vrot.slane %v1877_v55, 5  ;;  %v599_v25 = vrot.slane %v1879_v3, 4  ;;  %1303 = vmatprep.mubr.msk.f32.mxu1 %vm1488_vm0, %v2258_v17 }
  0x7d   :  { %v601_v56 = vrot.slane %v1881_v49, 3  ;;  %v1896_v29 = vld [vmem:[#allocation2 + $0x23] sm:$0x1]  ;;  %v588_v60 = vsel %vm148_vm5, %v587_v18, %v586_v61  ;;  %v603_v45 = vrot.slane %v1885_v36, 2  ;;  %v605_v33 = vrot.slane %v1887_v58, 1 }
  0x7e   :  { %2282 = vst [vmem:[#allocation59_spill] sm:$0xff] %v1896_v29  ;;  %v594_v1 = vsel %vm136_vm1, %v593_v63, %v1862_v39  ;;  %v1905_v62 = vld [vmem:[#allocation2 + $0x27] sm:$0x1]  ;;  %v1907_v55 = vld [vmem:[#allocation2 + $0x2b] sm:$0x1]  ;;  %v590_v49 = vsel %vm151_vm6, %v589_v13, %v588_v60  ;;  %vm284_vm9 = vcmask 261120  }
  0x7f   :  { %2283 = vst [vmem:[#allocation60_spill] sm:$0xff] %v1905_v62  ;;  %2284 = vst [vmem:[#allocation61_spill] sm:$0xff] %v1907_v55  ;;  %v596_v3 = vsel %vm139_vm2, %v595_v31, %v594_v1  ;;  %v1911_v32 = vld [vmem:[#allocation2 + $0x2f] sm:$0x1]  ;;  %v1913_v18 = vld [vmem:[#allocation2 + $0x33] sm:$0x1]  ;;  %v592_v63 = vsel %vm154_vm7, %v591_v34, %v590_v49 }
  0x80   :  { %2285 = vst [vmem:[#allocation62_spill] sm:$0xff] %v1911_v32  ;;  %2286 = vst [vmem:[#allocation63_spill] sm:$0xff] %v1913_v18  ;;  %v1915_v61 = vld [vmem:[#allocation2 + $0x37] sm:$0x1]  ;;  %v598_v36 = vsel %vm142_vm3, %v597_v40, %v596_v3  ;;  %v1919_v38 = vld [vmem:[#allocation2 + $0x3b] sm:$0x1]  ;;  %1291 = vmatmul.mubr.msk.f32.gmra.mrb[8].mxu0 %vm184_vm8, %v592_v63 }
  0x81   :  { %2287 = vst [vmem:[#allocation64_spill] sm:$0xff] %v1915_v61  ;;  %2288 = vst [vmem:[#allocation65_spill] sm:$0xff] %v1919_v38  ;;  %v1921_v58 = vld [vmem:[#allocation2 + $0x3f] sm:$0x1]  ;;  %v786_v39 = vrot.slane %v1905_v62, 7  ;;  %v788_v13 = vrot.slane %v1907_v55, 6  ;;  %v600_v31 = vsel %vm145_vm4, %v599_v25, %v598_v36  ;;  %1293 = vmatprep.mubr.msk.f32.mxu0 %vm1488_vm0, %v2258_v17 }
  0x82   :  { %2289 = vst [vmem:[#allocation66_spill] sm:$0xff] %v1921_v58  ;;  %v790_v60 = vrot.slane %v1911_v32, 5  ;;  %v792_v1 = vrot.slane %v1913_v18, 4  ;;  %v794_v34 = vrot.slane %v1915_v61, 3  ;;  %v1930_v49 = vld [vmem:[#allocation2 + $0x43] sm:$0x1]  ;;  %v602_v3 = vsel %vm148_vm5, %v601_v56, %v600_v31 }
  0x83   :  { %2290 = vst [vmem:[#allocation67_spill] sm:$0xff] %v1930_v49  ;;  %v787_v40 = vsel %vm136_vm1, %v786_v39, %v1896_v29  ;;  %v796_v63 = vrot.slane %v1919_v38, 2  ;;  %v798_v36 = vrot.slane %v1921_v58, 1  ;;  %v1939_v25 = vld [vmem:[#allocation2 + $0x47] sm:$0x1]  ;;  %v604_v61 = vsel %vm151_vm6, %v603_v45, %v602_v3 }
  0x84   :  { %2291 = vst [vmem:[#allocation68_spill] sm:$0xff] %v1939_v25  ;;  %v1941_v32 = vld [vmem:[#allocation2 + $0x4b] sm:$0x1]  ;;  %v789_v18 = vsel %vm139_vm2, %v788_v13, %v787_v40  ;;  %v1945_v55 = vld [vmem:[#allocation2 + $0x4f] sm:$0x1]  ;;  %v606_v39 = vsel %vm154_vm7, %v605_v33, %v604_v61  ;;  %v800_v58 = vrot.slane %v1939_v25, 7 }
  0x85   :  { %2292 = vst [vmem:[#allocation69_spill] sm:$0xff] %v1941_v32  ;;  %2293 = vst [vmem:[#allocation70_spill] sm:$0xff] %v1945_v55  ;;  %v1947_v62 = vld [vmem:[#allocation2 + $0x53] sm:$0x1]  ;;  %v1949_v56 = vld [vmem:[#allocation2 + $0x57] sm:$0x1]  ;;  %v791_v31 = vsel %vm142_vm3, %v790_v60, %v789_v18  ;;  %1294 = vmatmul.mubr.msk.f32.gmra.mrb[10].mxu0 %vm184_vm8, %v606_v39 }
  0x86   :  { %2294 = vst [vmem:[#allocation71_spill] sm:$0xff] %v1947_v62  ;;  %2295 = vst [vmem:[#allocation72_spill] sm:$0xff] %v1949_v56  ;;  %v1953_v38 = vld [vmem:[#allocation2 + $0x5b] sm:$0x1]  ;;  %v802_v29 = vrot.slane %v1941_v32, 6  ;;  %v793_v45 = vsel %vm145_vm4, %v792_v1, %v791_v31  ;;  %v804_v3 = vrot.slane %v1945_v55, 5  ;;  %v801_v18 = vsel %vm136_vm1, %v800_v58, %v1930_v49 }
  0x87   :  { %2296 = vst [vmem:[#allocation73_spill] sm:$0xff] %v1953_v38  ;;  %v1959_v13 = vld [vmem:[#allocation2 + $0x5f] sm:$0x1]  ;;  %v806_v40 = vrot.slane %v1947_v62, 4  ;;  %v795_v33 = vsel %vm148_vm5, %v794_v34, %v793_v45  ;;  %v808_v61 = vrot.slane %v1949_v56, 3  ;;  %v810_v39 = vrot.slane %v1953_v38, 2 }
  0x88   :  { %2297 = vst [vmem:[#allocation74_spill] sm:$0xff] %v1959_v13  ;;  %v797_v60 = vsel %vm151_vm6, %v796_v63, %v795_v33  ;;  %v803_v32 = vsel %vm139_vm2, %v802_v29, %v801_v18  ;;  %v812_v55 = vrot.slane %v1959_v13, 1  ;;  %vm932_vm15 = vcmask 31744  }
  0x89   :  { %v799_v1 = vsel %vm154_vm7, %v798_v36, %v797_v60  ;;  %v805_v31 = vsel %vm142_vm3, %v804_v3, %v803_v32  ;;  %v1981_v36 = vld [vmem:[#allocation7] ss:$0 sm:$0xff] }
  0x8a   :  { %1304 = vmatmul.mubr.msk.f32.gmra.mrb[8].mxu1 %vm184_vm8, %v799_v1  ;;  %v807_v34 = vsel %vm145_vm4, %v806_v40, %v805_v31 }
  0x8b   :  { %1306 = vmatprep.mubr.msk.f32.mxu1 %vm1488_vm0, %v2258_v17  ;;  %v809_v58 = vsel %vm148_vm5, %v808_v61, %v807_v34 }
  0x8c   :  { %v811_v63 = vsel %vm151_vm6, %v810_v39, %v809_v58 }
  0x8d   :  { %v813_v29 = vsel %vm154_vm7, %v812_v55, %v811_v63  ;;  %v1986_v55 = vld [vmem:[#allocation8] ss:$0 sm:$0xff] }
  0x8e   :  { %1307 = vmatmul.mubr.msk.f32.gmra.mrb[10].mxu1 %vm184_vm8, %v813_v29 }
 0x12d   :  { %v257_v32 = vpop.f32.mrb[0].mxu0 }
 0x12e   :  { %v258_v45 = vadd.f32 %v1981_v36, %v257_v32  ;;  %v1263_v3 = vpop.f32.mrb[1].mxu0 }
 0x130   :  { %1333 = vtanh.f32 %v258_v45 }
 0x131   :  { %v472_v33 = vpop.f32.mrb[0].mxu1 }
 0x132   :  { %v473_v40 = vadd.f32 %v1981_v36, %v472_v33  ;;  %v1276_v18 = vpop.f32.mrb[1].mxu1 }
 0x134   :  { %1335 = vtanh.f32 %v473_v40  ;;  %v262_v60 = vpop.f32.mrb[2].mxu0 }
 0x135   :  { %v263_v61 = vadd.f32 %v1981_v36, %v262_v60  ;;  %v1266_v39 = vpop.f32.mrb[3].mxu0 }
 0x137   :  { %1337 = vtanh.f32 %v263_v61 }
 0x138   :  { %v477_v1 = vpop.f32.mrb[2].mxu1 }
 0x139   :  { %v478_v34 = vadd.f32 %v1981_v36, %v477_v1  ;;  %v1279_v58 = vpop.f32.mrb[3].mxu1 }
 0x13a   :  { %v1334_v31 = vpop.eup %1333 }
 0x13b   :  { %v281_v63 = vmul.f32 %v1334_v31, %v1986_v55  ;;  %1339 = vtanh.f32 %v478_v34 }
 0x13d   :  { %v285_v32 = vsel %vm284_vm9, %v281_v63, 0.0 }
 0x13e   :  { %v267_v29 = vpop.f32.mrb[4].mxu0  ;;  %v1336_v45 = vpop.eup %1335  ;;  %286 = vadd.xlane.f32.xlu0 %v285_v32 }
 0x13f   :  { %v268_v3 = vadd.f32 %v1981_v36, %v267_v29  ;;  %v1269_v33 = vpop.f32.mrb[5].mxu0  ;;  %v489_v40 = vmul.f32 %v1336_v45, %v1986_v55 }
 0x141   :  { %1341 = vtanh.f32 %v268_v3  ;;  %v492_v60 = vsel %vm284_vm9, %v489_v40, 0.0  ;;  %v1338_v61 = vpop.eup %1337 }
 0x142   :  { %493 = vadd.xlane.f32.xlu1 %v492_v60  ;;  %v282_v31 = vmul.f32 %v1338_v61, %v1986_v55 }
 0x143   :  { %v482_v18 = vpop.f32.mrb[4].mxu1 }
 0x144   :  { %v483_v39 = vadd.f32 %v1981_v36, %v482_v18  ;;  %v1282_v1 = vpop.f32.mrb[5].mxu1  ;;  %v288_v58 = vsel %vm284_vm9, %v282_v31, 0.0 }
 0x145   :  { %v1340_v63 = vpop.eup %1339  ;;  %289 = vadd.xlane.f32.xlu0 %v288_v58 }
 0x146   :  { %1343 = vtanh.f32 %v483_v39  ;;  %v490_v45 = vmul.f32 %v1340_v63, %v1986_v55 }
 0x148   :  { %v679_v34 = vpop.f32.mrb[6].mxu0  ;;  %v495_v33 = vsel %vm284_vm9, %v490_v45, 0.0 }
 0x149   :  { %v680_v29 = vadd.f32 %v1981_v36, %v679_v34  ;;  %v1289_v32 = vpop.f32.mrb[7].mxu0  ;;  %496 = vadd.xlane.f32.xlu1 %v495_v33 }
 0x14b   :  { %1345 = vtanh.f32 %v680_v29  ;;  %v1342_v40 = vpop.eup %1341 }
 0x14c   :  { %v283_v61 = vmul.f32 %v1342_v40, %v1986_v55 }
 0x14e   :  { %v886_v3 = vpop.f32.mrb[6].mxu1  ;;  %v291_v1 = vsel %vm284_vm9, %v283_v61, 0.0 }
 0x14f   :  { %v887_v18 = vadd.f32 %v1981_v36, %v886_v3  ;;  %v1302_v60 = vpop.f32.mrb[7].mxu1  ;;  %292 = vadd.xlane.f32.xlu0 %v291_v1 }
 0x150   :  { %v1344_v31 = vpop.eup %1343 }
 0x151   :  { %1347 = vtanh.f32 %v887_v18  ;;  %v491_v63 = vmul.f32 %v1344_v31, %v1986_v55 }
 0x153   :  { %v684_v39 = vpop.f32.mrb[8].mxu0  ;;  %v498_v32 = vsel %vm284_vm9, %v491_v63, 0.0 }
 0x154   :  { %v685_v34 = vadd.f32 %v1981_v36, %v684_v39  ;;  %v1292_v58 = vpop.f32.mrb[9].mxu0  ;;  %499 = vadd.xlane.f32.xlu1 %v498_v32 }
 0x155   :  { %v1346_v45 = vpop.eup %1345 }
 0x156   :  { %1349 = vtanh.f32 %v685_v34  ;;  %v696_v40 = vmul.f32 %v1346_v45, %v1986_v55 }
 0x158   :  { %v689_v29 = vpop.f32.mrb[10].mxu0  ;;  %v699_v60 = vsel %vm284_vm9, %v696_v40, 0.0 }
 0x159   :  { %v690_v3 = vadd.f32 %v1981_v36, %v689_v29  ;;  %v1295_v33 = vpop.f32.mrb[11].mxu0  ;;  %700 = vadd.xlane.f32.xlu0 %v699_v60 }
 0x15b   :  { %1351 = vtanh.f32 %v690_v3  ;;  %v1348_v61 = vpop.eup %1347 }
 0x15c   :  { %v903_v31 = vmul.f32 %v1348_v61, %v1986_v55 }
 0x15d   :  { %v891_v18 = vpop.f32.mrb[8].mxu1 }
 0x15e   :  { %v892_v39 = vadd.f32 %v1981_v36, %v891_v18  ;;  %v1305_v1 = vpop.f32.mrb[9].mxu1  ;;  %v906_v58 = vsel %vm284_vm9, %v903_v31, 0.0 }
 0x15f   :  { %907 = vadd.xlane.f32.xlu1 %v906_v58 }
 0x160   :  { %1353 = vtanh.f32 %v892_v39  ;;  %v1350_v63 = vpop.eup %1349 }
 0x161   :  { %v896_v34 = vpop.f32.mrb[10].mxu1  ;;  %v697_v45 = vmul.f32 %v1350_v63, %v1986_v55  ;;  %v69_v63 = vlaneseq }
 0x162   :  { %v897_v29 = vadd.f32 %v1981_v36, %v896_v34  ;;  %v1308_v32 = vpop.f32.mrb[11].mxu1 }
 0x163   :  { %v702_v3 = vsel %vm284_vm9, %v697_v45, 0.0 }
 0x164   :  { %1355 = vtanh.f32 %v897_v29  ;;  %703 = vadd.xlane.f32.xlu1 %v702_v3  ;;  %v72_v29 = vshrl.u32 %v69_v63, 7 }
 0x165   :  { %v1352_v33 = vpop.eup %1351 }
 0x166   :  { %v698_v40 = vmul.f32 %v1352_v33, %v1986_v55  ;;  %v74_v3 = vadd.s32 16, %v72_v29 }
 0x168   :  { %v705_v18 = vsel %vm284_vm9, %v698_v40, 0.0  ;;  %vm77_vm10 = vcmp.lt.s32.totalorder %v74_v3, 20 }
 0x169   :  { %706 = vadd.xlane.f32.xlu0 %v705_v18 }
 0x16a   :  { %v1354_v60 = vpop.eup %1353 }
 0x16b   :  { %v904_v61 = vmul.f32 %v1354_v60, %v1986_v55 }
 0x16d   :  { %v909_v39 = vsel %vm284_vm9, %v904_v61, 0.0 }
 0x16e   :  { %v1356_v36 = vpop.eup %1355  ;;  %910 = vadd.xlane.f32.xlu0 %v909_v39 }
 0x16f   :  { %v905_v1 = vmul.f32 %v1356_v36, %v1986_v55 }
 0x171   :  { %v912_v31 = vsel %vm284_vm9, %v905_v1, 0.0 }
 0x172   :  { %913 = vadd.xlane.f32.xlu1 %v912_v31 }
 0x1cb   :  { %v287_v58 = vpop.xlane.xlu0 %286 }
 0x1cf   :  { %v494_v34 = vpop.xlane.xlu1 %493 }
 0x1d2   :  { %v290_v45 = vpop.xlane.xlu0 %289 }
 0x1d3   :  { %v297_v39 = vadd.f32 %v290_v45, %v287_v58 }
 0x1d6   :  { %v497_v32 = vpop.xlane.xlu1 %496 }
 0x1d7   :  { %v504_v61 = vadd.f32 %v497_v32, %v494_v34 }
 0x1dc   :  { %v293_v40 = vpop.xlane.xlu0 %292 }
 0x1dd   :  { %v296_v60 = vsel %vm77_vm10, %v293_v40, 0.0 }
 0x1de   :  { %v298_v36 = vadd.f32 %v297_v39, %v296_v60 }
 0x1e0   :  { %v299_v13 = vrot.slane %v298_v36, 4 }
 0x1e1   :  { %v500_v33 = vpop.xlane.xlu1 %499 }
 0x1e2   :  { %v503_v18 = vsel %vm77_vm10, %v500_v33, 0.0  ;;  %v300_v25 = vadd.f32 %v299_v13, %v298_v36 }
 0x1e3   :  { %v505_v55 = vadd.f32 %v504_v61, %v503_v18  ;;  %v70_v18 = vand.u32 127, %v69_v63 }
 0x1e4   :  { %v301_v16 = vrot.slane %v300_v25, 2 }
 0x1e5   :  { %v506_v31 = vrot.slane %v505_v55, 4  ;;  %vm305_vm11 = vcmp.eq.s32.totalorder %v70_v18, 0  ;;  %vm512_vm12 = vcmp.eq.s32.totalorder %v70_v18, 1  ;;  %vm719_vm13 = vcmp.eq.s32.totalorder %v70_v18, 2 }
 0x1e6   :  { %v701_v38 = vpop.xlane.xlu0 %700  ;;  %v302_v58 = vadd.f32 %v301_v16, %v300_v25  ;;  %v1228_v16 = vsel %vm512_vm12, 1.0, %v2258_v17  ;;  %v1232_v25 = vsel %vm719_vm13, 1.0, %v2258_v17  ;;  %vm926_vm14 = vcmp.eq.s32.totalorder %v70_v18, 3 }
 0x1e7   :  { %v507_v62 = vadd.f32 %v506_v31, %v505_v55 }
 0x1e8   :  { %v303_v13 = vrot.slane %v302_v58, 1 }
 0x1e9   :  { %v508_v19 = vrot.slane %v507_v62, 2 }
 0x1eb   :  { %v509_v34 = vadd.f32 %v508_v19, %v507_v62 }
 0x1ec   :  { %v908_v1 = vpop.xlane.xlu1 %907 }
 0x1ed   :  { %v510_v55 = vrot.slane %v509_v34, 1 }
 0x1f1   :  { %v704_v56 = vpop.xlane.xlu1 %703 }
 0x1f2   :  { %v711_v49 = vadd.f32 %v704_v56, %v701_v38 }
 0x1f6   :  { %v707_v29 = vpop.xlane.xlu0 %706 }
 0x1f7   :  { %v710_v21 = vsel %vm77_vm10, %v707_v29, 0.0 }
 0x1f8   :  { %v712_v33 = vadd.f32 %v711_v49, %v710_v21  ;;  %v511_v21 = vadd.f32 %v510_v55, %v509_v34  ;;  %v304_v49 = vadd.f32 %v303_v13, %v302_v58 }
 0x1fa   :  { %v713_v15 = vrot.slane %v712_v33, 4 }
 0x1fb   :  { %v911_v40 = vpop.xlane.xlu0 %910 }
 0x1fc   :  { %v714_v32 = vadd.f32 %v713_v15, %v712_v33  ;;  %v918_v45 = vadd.f32 %v911_v40, %v908_v1  ;;  %v1224_v15 = vsel %vm305_vm11, 1.0, %v2258_v17  ;;  %v515_v1 = vmul.f32 %v1228_v16, %v511_v21 }
 0x1fd   :  { %v308_v3 = vmul.f32 %v1224_v15, %v304_v49 }
 0x1fe   :  { %v715_v60 = vrot.slane %v714_v32, 2 }
 0x1ff   :  { %v914_v61 = vpop.xlane.xlu1 %913  ;;  %v516_v34 = vadd.f32 %v515_v1, %v308_v3 }
 0x200   :  { %v917_v39 = vsel %vm77_vm10, %v914_v61, 0.0  ;;  %v716_v38 = vadd.f32 %v715_v60, %v714_v32  ;;  %v1236_v32 = vsel %vm926_vm14, 1.0, %v2258_v17 }
 0x201   :  { %v919_v56 = vadd.f32 %v918_v45, %v917_v39 }
 0x202   :  { %v717_v36 = vrot.slane %v716_v38, 1 }
 0x203   :  { %v920_v31 = vrot.slane %v919_v56, 4 }
 0x204   :  { %v718_v19 = vadd.f32 %v717_v36, %v716_v38 }
 0x205   :  { %v921_v29 = vadd.f32 %v920_v31, %v919_v56 }
 0x206   :  { %v722_v40 = vmul.f32 %v1232_v25, %v718_v19 }
 0x207   :  { %v922_v62 = vrot.slane %v921_v29, 2 }
 0x208   :  { %v723_v45 = vadd.f32 %v722_v40, %v516_v34 }
 0x209   :  { %v923_v63 = vadd.f32 %v922_v62, %v921_v29 }
 0x20b   :  { %v924_v33 = vrot.slane %v923_v63, 1 }
 0x20d   :  { %v925_v58 = vadd.f32 %v924_v33, %v923_v63 }
 0x20f   :  { %v929_v60 = vmul.f32 %v1236_v32, %v925_v58 }
 0x211   :  { %v930_v61 = vadd.f32 %v929_v60, %v723_v45 }
 0x213   :  { %v931_v39 = vmul.f32 0.05, %v930_v61 }
 0x215   :  { %v933_v55 = vsel %vm932_vm15, %v931_v39, -inf }
 0x216   :  { %934 = vmax.xlane.f32.xlu0 %v933_v55 }
 0x2a3   :  { %v935_v13 = vpop.xlane.xlu0 %934 }
 0x2a4   :  { %v936_v38 = vsub.f32 %v931_v39, %v935_v13  ;;  %v2298_v13 = vld [vmem:[#allocation15_spill] sm:$0xff] }
 0x2a6   :  { %v937_v56 = vmul.f32 1.442695, %v936_v38  ;;  %v2299_v38 = vld [vmem:[#allocation16_spill] sm:$0xff] }
 0x2a8   :  { %1357 = vpow2.f32 %v937_v56  ;;  %v2300_v56 = vld [vmem:[#allocation17_spill] sm:$0xff] }
 0x2b2   :  { %v1358_v36 = vpop.eup %1357 }
 0x2b3   :  { %v939_v18 = vsel %vm932_vm15, %v1358_v36, 0.0 }
 0x2b4   :  { %940 = vadd.xlane.f32.xlu1 %v939_v18  ;;  %v2302_v18 = vld [vmem:[#allocation19_spill] sm:$0xff] }
 0x341   :  { %v941_v31 = vpop.xlane.xlu1 %940 }
 0x342   :  { %1359 = vrcp.f32 %v941_v31  ;;  %v2303_v31 = vld [vmem:[#allocation20_spill] sm:$0xff] }
 0x34c   :  { %v1360_v17 = vpop.eup %1359 }
 0x34d   :  { %v943_v21 = vmul.f32 %v1360_v17, %v1358_v36  ;;  %v2301_v36 = vld [vmem:[#allocation18_spill] sm:$0xff]  ;;  %v2304_v17 = vld [vmem:[#allocation21_spill] sm:$0xff] }
 0x34f   :  { %v972_v49 = vmul.f32 %v1228_v16, %v943_v21  ;;  %v944_v29 = vmul.f32 %v1224_v15, %v943_v21  ;;  %v1076_v63 = vmul.f32 %v1236_v32, %v943_v21  ;;  %v1024_v3 = vmul.f32 %v1232_v25, %v943_v21  ;;  %v2305_v21 = vld [vmem:[#allocation22_spill] sm:$0xff] }
 0x351   :  { %v973_v19 = vsel %vm932_vm15, %v972_v49, 0.0  ;;  %v945_v62 = vsel %vm932_vm15, %v944_v29, 0.0  ;;  %v1077_v1 = vsel %vm932_vm15, %v1076_v63, 0.0  ;;  %v1025_v33 = vsel %vm932_vm15, %v1024_v3, 0.0  ;;  %v2306_v49 = vld [vmem:[#allocation23_spill] sm:$0xff]  ;;  %v2307_v29 = vld [vmem:[#allocation24_spill] sm:$0xff] }
 0x352   :  { %974 = vadd.xlane.f32.xlu1 %v973_v19  ;;  %946 = vadd.xlane.f32.xlu0 %v945_v62  ;;  %v2308_v19 = vld [vmem:[#allocation25_spill] sm:$0xff]  ;;  %v2309_v63 = vld [vmem:[#allocation26_spill] sm:$0xff] }
 0x356   :  { %1078 = vadd.xlane.f32.xlu1 %v1077_v1  ;;  %1026 = vadd.xlane.f32.xlu0 %v1025_v33 }
 0x3df   :  { %v947_v40 = vpop.xlane.xlu0 %946  ;;  %v975_v55 = vpop.xlane.xlu1 %974 }
 0x3e0   :  { %v948_v34 = vmul.f32 %v947_v40, %v1571_v4  ;;  %v949_v16 = vmul.f32 %v947_v40, %v1575_v6  ;;  %v950_v15 = vmul.f32 %v947_v40, %v1577_v7  ;;  %v951_v58 = vmul.f32 %v947_v40, %v1579_v8 }
 0x3e1   :  { %v952_v32 = vmul.f32 %v947_v40, %v1581_v9  ;;  %v953_v25 = vmul.f32 %v947_v40, %v1583_v10  ;;  %v954_v45 = vmul.f32 %v947_v40, %v1585_v11  ;;  %v955_v60 = vmul.f32 %v947_v40, %v1589_v12 }
 0x3e2   :  { %v956_v61 = vmul.f32 %v947_v40, %v1624_v37  ;;  %v957_v39 = vmul.f32 %v947_v40, %v1631_v42  ;;  %v958_v4 = vmul.f32 %v947_v40, %v1633_v43  ;;  %v959_v6 = vmul.f32 %v947_v40, %v1637_v46 }
 0x3e3   :  { %v960_v7 = vmul.f32 %v947_v40, %v1639_v47  ;;  %v961_v8 = vmul.f32 %v947_v40, %v1641_v48  ;;  %v962_v9 = vmul.f32 %v947_v40, %v1645_v51  ;;  %v963_v10 = vmul.f32 %v947_v40, %v1647_v52 }
 0x3e4   :  { %v964_v11 = vmul.f32 %v947_v40, %v1691_v35  ;;  %v965_v12 = vmul.f32 %v947_v40, %v1701_v41  ;;  %v966_v37 = vmul.f32 %v947_v40, %v1703_v44  ;;  %v967_v42 = vmul.f32 %v947_v40, %v1707_v50 }
 0x3e5   :  { %v968_v43 = vmul.f32 %v947_v40, %v1709_v53  ;;  %v969_v46 = vmul.f32 %v947_v40, %v1711_v54  ;;  %v970_v47 = vmul.f32 %v947_v40, %v1715_v57  ;;  %v971_v48 = vmul.f32 %v947_v40, %v1717_v5 }
 0x3e6   :  { %v976_v51 = vmul.f32 %v975_v55, %v1598_v20  ;;  %v977_v52 = vmul.f32 %v975_v55, %v1602_v22  ;;  %v978_v35 = vmul.f32 %v975_v55, %v1604_v23  ;;  %v979_v41 = vmul.f32 %v975_v55, %v1606_v24 }
 0x3e7   :  { %v980_v44 = vmul.f32 %v975_v55, %v1609_v26  ;;  %v981_v50 = vmul.f32 %v975_v55, %v1611_v27  ;;  %v982_v53 = vmul.f32 %v975_v55, %v1613_v28  ;;  %v983_v54 = vmul.f32 %v975_v55, %v1616_v30 }
 0x3e8   :  { %v984_v57 = vmul.f32 %v975_v55, %v1656_v59  ;;  %v985_v5 = vmul.f32 %v975_v55, %v1666_v0  ;;  %v986_v20 = vmul.f32 %v975_v55, %v1668_v2  ;;  %v987_v22 = vmul.f32 %v975_v55, %v1672_v14 }
 0x3e9   :  { %v988_v23 = vmul.f32 %v975_v55, %v2298_v13  ;;  %v989_v24 = vmul.f32 %v975_v55, %v2299_v38  ;;  %v990_v26 = vmul.f32 %v975_v55, %v2300_v56  ;;  %v991_v27 = vmul.f32 %v975_v55, %v2301_v36 }
 0x3ea   :  { %v992_v28 = vmul.f32 %v975_v55, %v2302_v18  ;;  %v993_v30 = vmul.f32 %v975_v55, %v2303_v31  ;;  %v994_v59 = vmul.f32 %v975_v55, %v2304_v17  ;;  %v995_v0 = vmul.f32 %v975_v55, %v2305_v21 }
 0x3eb   :  { %v996_v2 = vmul.f32 %v975_v55, %v2306_v49  ;;  %v997_v14 = vmul.f32 %v975_v55, %v2307_v29  ;;  %v998_v62 = vmul.f32 %v975_v55, %v2308_v19  ;;  %v999_v3 = vmul.f32 %v975_v55, %v2309_v63  ;;  %v1027_v49 = vpop.xlane.xlu0 %1026 }
 0x3ec   :  { %v1000_v1 = vadd.f32 %v976_v51, %v948_v34  ;;  %v1001_v33 = vadd.f32 %v977_v52, %v949_v16  ;;  %v1002_v40 = vadd.f32 %v978_v35, %v950_v15  ;;  %v1003_v13 = vadd.f32 %v979_v41, %v951_v58 }
 0x3ed   :  { %v1004_v38 = vadd.f32 %v980_v44, %v952_v32  ;;  %v1005_v56 = vadd.f32 %v981_v50, %v953_v25  ;;  %v1006_v36 = vadd.f32 %v982_v53, %v954_v45  ;;  %v1007_v18 = vadd.f32 %v983_v54, %v955_v60  ;;  %v2310_v25 = vld [vmem:[#allocation27_spill] sm:$0xff]  ;;  %v2311_v60 = vld [vmem:[#allocation28_spill] sm:$0xff]  ;;  %v2313_v44 = vld [vmem:[#allocation30_spill] sm:$0xff] }
 0x3ee   :  { %v1008_v31 = vadd.f32 %v984_v57, %v956_v61  ;;  %v1009_v17 = vadd.f32 %v985_v5, %v957_v39  ;;  %v1010_v21 = vadd.f32 %v986_v20, %v958_v4  ;;  %v1011_v29 = vadd.f32 %v987_v22, %v959_v6  ;;  %v2312_v39 = vld [vmem:[#allocation29_spill] sm:$0xff]  ;;  %v2321_v54 = vld [vmem:[#allocation46_spill] sm:$0xff]  ;;  %v2322_v5 = vld [vmem:[#allocation47_spill] sm:$0xff] }
 0x3ef   :  { %v1012_v19 = vadd.f32 %v988_v23, %v960_v7  ;;  %v1013_v55 = vadd.f32 %v989_v24, %v961_v8  ;;  %v1014_v63 = vadd.f32 %v990_v26, %v962_v9  ;;  %v1015_v34 = vadd.f32 %v991_v27, %v963_v10  ;;  %v2314_v7 = vld [vmem:[#allocation31_spill] sm:$0xff]  ;;  %v2315_v9 = vld [vmem:[#allocation32_spill] sm:$0xff]  ;;  %v2320_v50 = vld [vmem:[#allocation45_spill] sm:$0xff] }
 0x3f0   :  { %v1016_v51 = vadd.f32 %v992_v28, %v964_v11  ;;  %v1017_v16 = vadd.f32 %v993_v30, %v965_v12  ;;  %v1018_v52 = vadd.f32 %v994_v59, %v966_v37  ;;  %v1019_v15 = vadd.f32 %v995_v0, %v967_v42  ;;  %v2316_v11 = vld [vmem:[#allocation33_spill] sm:$0xff]  ;;  %v2317_v37 = vld [vmem:[#allocation34_spill] sm:$0xff]  ;;  %v2323_v22 = vld [vmem:[#allocation48_spill] sm:$0xff] }
 0x3f1   :  { %v1020_v35 = vadd.f32 %v996_v2, %v968_v43  ;;  %v1021_v41 = vadd.f32 %v997_v14, %v969_v46  ;;  %v1022_v58 = vadd.f32 %v998_v62, %v970_v47  ;;  %v1023_v32 = vadd.f32 %v999_v3, %v971_v48  ;;  %v2318_v43 = vld [vmem:[#allocation43_spill] sm:$0xff]  ;;  %v2319_v47 = vld [vmem:[#allocation44_spill] sm:$0xff]  ;;  %v2324_v24 = vld [vmem:[#allocation49_spill] sm:$0xff] }
 0x3f2   :  { %v1028_v45 = vmul.f32 %v1027_v49, %v2310_v25  ;;  %v1029_v61 = vmul.f32 %v1027_v49, %v2311_v60  ;;  %v1030_v4 = vmul.f32 %v1027_v49, %v2312_v39  ;;  %v1031_v6 = vmul.f32 %v1027_v49, %v2313_v44  ;;  %v2325_v27 = vld [vmem:[#allocation50_spill] sm:$0xff]  ;;  %v2326_v30 = vld [vmem:[#allocation51_spill] sm:$0xff]  ;;  %v2327_v0 = vld [vmem:[#allocation52_spill] sm:$0xff] }
 0x3f3   :  { %v1032_v8 = vmul.f32 %v1027_v49, %v2314_v7  ;;  %v1033_v10 = vmul.f32 %v1027_v49, %v2315_v9  ;;  %v1034_v12 = vmul.f32 %v1027_v49, %v2316_v11  ;;  %v1035_v42 = vmul.f32 %v1027_v49, %v2317_v37  ;;  %v2328_v14 = vld [vmem:[#allocation53_spill] sm:$0xff]  ;;  %v2329_v3 = vld [vmem:[#allocation54_spill] sm:$0xff]  ;;  %v2330_v60 = vld [vmem:[#allocation55_spill] sm:$0xff] }
 0x3f4   :  { %v1036_v46 = vmul.f32 %v1027_v49, %v2318_v43  ;;  %v1037_v48 = vmul.f32 %v1027_v49, %v2319_v47  ;;  %v1038_v53 = vmul.f32 %v1027_v49, %v2320_v50  ;;  %v1039_v57 = vmul.f32 %v1027_v49, %v2321_v54  ;;  %v2331_v44 = vld [vmem:[#allocation56_spill] sm:$0xff]  ;;  %v2332_v9 = vld [vmem:[#allocation57_spill] sm:$0xff]  ;;  %v2333_v37 = vld [vmem:[#allocation58_spill] sm:$0xff] }
 0x3f5   :  { %v1040_v20 = vmul.f32 %v1027_v49, %v2322_v5  ;;  %v1041_v23 = vmul.f32 %v1027_v49, %v2323_v22  ;;  %v1042_v26 = vmul.f32 %v1027_v49, %v2324_v24  ;;  %v1043_v28 = vmul.f32 %v1027_v49, %v2325_v27 }
 0x3f6   :  { %v1044_v59 = vmul.f32 %v1027_v49, %v2326_v30  ;;  %v1045_v2 = vmul.f32 %v1027_v49, %v2327_v0  ;;  %v1046_v62 = vmul.f32 %v1027_v49, %v2328_v14  ;;  %v1047_v25 = vmul.f32 %v1027_v49, %v2329_v3 }
 0x3f7   :  { %v1048_v39 = vmul.f32 %v1027_v49, %v2330_v60  ;;  %v1049_v7 = vmul.f32 %v1027_v49, %v2331_v44  ;;  %v1050_v11 = vmul.f32 %v1027_v49, %v2332_v9  ;;  %v1051_v43 = vmul.f32 %v1027_v49, %v2333_v37  ;;  %v1079_v60 = vpop.xlane.xlu1 %1078 }
 0x3f8   :  { %v1052_v47 = vadd.f32 %v1028_v45, %v1000_v1  ;;  %v1053_v50 = vadd.f32 %v1029_v61, %v1001_v33  ;;  %v1054_v54 = vadd.f32 %v1030_v4, %v1002_v40  ;;  %v1055_v5 = vadd.f32 %v1031_v6, %v1003_v13 }
 0x3f9   :  { %v1056_v22 = vadd.f32 %v1032_v8, %v1004_v38  ;;  %v1057_v24 = vadd.f32 %v1033_v10, %v1005_v56  ;;  %v1058_v27 = vadd.f32 %v1034_v12, %v1006_v36  ;;  %v1059_v30 = vadd.f32 %v1035_v42, %v1007_v18  ;;  %v2334_v56 = vld [vmem:[#allocation35_spill] sm:$0xff]  ;;  %v2335_v18 = vld [vmem:[#allocation36_spill] sm:$0xff]  ;;  %v2337_v8 = vld [vmem:[#allocation38_spill] sm:$0xff] }
 0x3fa   :  { %v1060_v0 = vadd.f32 %v1036_v46, %v1008_v31  ;;  %v1061_v14 = vadd.f32 %v1037_v48, %v1009_v17  ;;  %v1062_v3 = vadd.f32 %v1038_v53, %v1010_v21  ;;  %v1063_v44 = vadd.f32 %v1039_v57, %v1011_v29  ;;  %v2336_v17 = vld [vmem:[#allocation37_spill] sm:$0xff]  ;;  %v2345_v42 = vld [vmem:[#allocation62_spill] sm:$0xff]  ;;  %v2346_v48 = vld [vmem:[#allocation63_spill] sm:$0xff] }
 0x3fb   :  { %v1064_v9 = vadd.f32 %v1040_v20, %v1012_v19  ;;  %v1065_v37 = vadd.f32 %v1041_v23, %v1013_v55  ;;  %v1066_v49 = vadd.f32 %v1042_v26, %v1014_v63  ;;  %v1067_v1 = vadd.f32 %v1043_v28, %v1015_v34  ;;  %v2338_v19 = vld [vmem:[#allocation39_spill] sm:$0xff]  ;;  %v2339_v63 = vld [vmem:[#allocation40_spill] sm:$0xff]  ;;  %v2344_v10 = vld [vmem:[#allocation61_spill] sm:$0xff] }
 0x3fc   :  { %v1068_v45 = vadd.f32 %v1044_v59, %v1016_v51  ;;  %v1069_v33 = vadd.f32 %v1045_v2, %v1017_v16  ;;  %v1070_v61 = vadd.f32 %v1046_v62, %v1018_v52  ;;  %v1071_v4 = vadd.f32 %v1047_v25, %v1019_v15  ;;  %v2340_v51 = vld [vmem:[#allocation41_spill] sm:$0xff]  ;;  %v2341_v52 = vld [vmem:[#allocation42_spill] sm:$0xff]  ;;  %v2347_v57 = vld [vmem:[#allocation64_spill] sm:$0xff] }
 0x3fd   :  { %v1072_v40 = vadd.f32 %v1048_v39, %v1020_v35  ;;  %v1073_v6 = vadd.f32 %v1049_v7, %v1021_v41  ;;  %v1074_v13 = vadd.f32 %v1050_v11, %v1022_v58  ;;  %v1075_v38 = vadd.f32 %v1051_v43, %v1023_v32  ;;  %v2342_v35 = vld [vmem:[#allocation59_spill] sm:$0xff]  ;;  %v2343_v58 = vld [vmem:[#allocation60_spill] sm:$0xff]  ;;  %v2348_v23 = vld [vmem:[#allocation65_spill] sm:$0xff] }
 0x3fe   :  { %v1080_v36 = vmul.f32 %v1079_v60, %v2334_v56  ;;  %v1081_v31 = vmul.f32 %v1079_v60, %v2335_v18  ;;  %v1082_v21 = vmul.f32 %v1079_v60, %v2336_v17  ;;  %v1083_v29 = vmul.f32 %v1079_v60, %v2337_v8  ;;  %v2349_v28 = vld [vmem:[#allocation66_spill] sm:$0xff]  ;;  %v2350_v2 = vld [vmem:[#allocation67_spill] sm:$0xff]  ;;  %v2351_v25 = vld [vmem:[#allocation68_spill] sm:$0xff] }
 0x3ff   :  { %v1084_v55 = vmul.f32 %v1079_v60, %v2338_v19  ;;  %v1085_v34 = vmul.f32 %v1079_v60, %v2339_v63  ;;  %v1086_v16 = vmul.f32 %v1079_v60, %v2340_v51  ;;  %v1087_v15 = vmul.f32 %v1079_v60, %v2341_v52  ;;  %v2352_v7 = vld [vmem:[#allocation69_spill] sm:$0xff]  ;;  %v2353_v43 = vld [vmem:[#allocation70_spill] sm:$0xff]  ;;  %v2354_v18 = vld [vmem:[#allocation71_spill] sm:$0xff] }
 0x400   :  { %v1088_v41 = vmul.f32 %v1079_v60, %v2342_v35  ;;  %v1089_v32 = vmul.f32 %v1079_v60, %v2343_v58  ;;  %v1090_v12 = vmul.f32 %v1079_v60, %v2344_v10  ;;  %v1091_v46 = vmul.f32 %v1079_v60, %v2345_v42  ;;  %v2355_v8 = vld [vmem:[#allocation72_spill] sm:$0xff]  ;;  %v2356_v63 = vld [vmem:[#allocation73_spill] sm:$0xff]  ;;  %v2357_v52 = vld [vmem:[#allocation74_spill] sm:$0xff] }
 0x401   :  { %v1092_v53 = vmul.f32 %v1079_v60, %v2346_v48  ;;  %v1093_v20 = vmul.f32 %v1079_v60, %v2347_v57  ;;  %v1094_v26 = vmul.f32 %v1079_v60, %v2348_v23  ;;  %v1095_v59 = vmul.f32 %v1079_v60, %v2349_v28 }
 0x402   :  { %v1096_v62 = vmul.f32 %v1079_v60, %v2350_v2  ;;  %v1097_v39 = vmul.f32 %v1079_v60, %v2351_v25  ;;  %v1098_v11 = vmul.f32 %v1079_v60, %v2352_v7  ;;  %v1099_v56 = vmul.f32 %v1079_v60, %v2353_v43 }
 0x403   :  { %v1100_v17 = vmul.f32 %v1079_v60, %v2354_v18  ;;  %v1101_v19 = vmul.f32 %v1079_v60, %v2355_v8  ;;  %v1102_v51 = vmul.f32 %v1079_v60, %v2356_v63  ;;  %v1103_v35 = vmul.f32 %v1079_v60, %v2357_v52 }
 0x404   :  { %v1104_v58 = vadd.f32 %v1080_v36, %v1052_v47  ;;  %v1105_v10 = vadd.f32 %v1081_v31, %v1053_v50  ;;  %v1106_v42 = vadd.f32 %v1082_v21, %v1054_v54  ;;  %v1107_v48 = vadd.f32 %v1083_v29, %v1055_v5 }
 0x405   :  { %v1108_v57 = vadd.f32 %v1084_v55, %v1056_v22  ;;  %v1109_v23 = vadd.f32 %v1085_v34, %v1057_v24  ;;  %v1110_v28 = vadd.f32 %v1086_v16, %v1058_v27  ;;  %v1111_v2 = vadd.f32 %v1087_v15, %v1059_v30 }
 0x406   :  { %v1112_v25 = vadd.f32 %v1088_v41, %v1060_v0  ;;  %v1113_v7 = vadd.f32 %v1089_v32, %v1061_v14  ;;  %v1114_v43 = vadd.f32 %v1090_v12, %v1062_v3  ;;  %v1115_v18 = vadd.f32 %v1091_v46, %v1063_v44 }
 0x407   :  { %v1116_v8 = vadd.f32 %v1092_v53, %v1064_v9  ;;  %v1117_v63 = vadd.f32 %v1093_v20, %v1065_v37  ;;  %v1118_v52 = vadd.f32 %v1094_v26, %v1066_v49  ;;  %v1119_v60 = vadd.f32 %v1095_v59, %v1067_v1 }
 0x408   :  { %v1120_v36 = vadd.f32 %v1096_v62, %v1068_v45  ;;  %v1121_v47 = vadd.f32 %v1097_v39, %v1069_v33  ;;  %v1122_v31 = vadd.f32 %v1098_v11, %v1070_v61  ;;  %v1123_v50 = vadd.f32 %v1099_v56, %v1071_v4 }
 0x409   :  { %v1124_v21 = vadd.f32 %v1100_v17, %v1072_v40  ;;  %v1125_v54 = vadd.f32 %v1101_v19, %v1073_v6  ;;  %v1126_v5 = vadd.f32 %v1102_v51, %v1074_v13  ;;  %v1127_v29 = vadd.f32 %v1103_v35, %v1075_v38 }
 0x40a   :  { %v1152_v22 = vrot.slane %v1105_v10, 7  ;;  %v1154_v24 = vrot.slane %v1106_v42, 6  ;;  %v1156_v27 = vrot.slane %v1107_v48, 5  ;;  %v1158_v30 = vrot.slane %v1108_v57, 4 }
 0x40b   :  { %v1160_v0 = vrot.slane %v1109_v23, 3  ;;  %v1162_v14 = vrot.slane %v1110_v28, 2  ;;  %v1166_v3 = vrot.slane %v1113_v7, 7  ;;  %v1164_v9 = vrot.slane %v1111_v2, 1 }
 0x40c   :  { %v1153_v44 = vsel %vm136_vm1, %v1152_v22, %v1104_v58  ;;  %v1168_v37 = vrot.slane %v1114_v43, 6  ;;  %v1170_v49 = vrot.slane %v1115_v18, 5  ;;  %v1172_v33 = vrot.slane %v1116_v8, 4 }
 0x40d   :  { %v1155_v1 = vsel %vm139_vm2, %v1154_v24, %v1153_v44  ;;  %v1167_v45 = vsel %vm136_vm1, %v1166_v3, %v1112_v25  ;;  %v1174_v61 = vrot.slane %v1117_v63, 3  ;;  %v1176_v6 = vrot.slane %v1118_v52, 2 }
 0x40e   :  { %v1157_v4 = vsel %vm142_vm3, %v1156_v27, %v1155_v1  ;;  %v1169_v40 = vsel %vm139_vm2, %v1168_v37, %v1167_v45  ;;  %v1180_v13 = vrot.slane %v1121_v47, 7  ;;  %v1178_v34 = vrot.slane %v1119_v60, 1 }
 0x40f   :  { %v1159_v38 = vsel %vm145_vm4, %v1158_v30, %v1157_v4  ;;  %v1171_v55 = vsel %vm142_vm3, %v1170_v49, %v1169_v40  ;;  %v1182_v16 = vrot.slane %v1122_v31, 6  ;;  %v1184_v12 = vrot.slane %v1123_v50, 5 }
 0x410   :  { %v1161_v15 = vsel %vm148_vm5, %v1160_v0, %v1159_v38  ;;  %v1173_v41 = vsel %vm145_vm4, %v1172_v33, %v1171_v55  ;;  %v1181_v32 = vsel %vm136_vm1, %v1180_v13, %v1120_v36  ;;  %v1186_v26 = vrot.slane %v1124_v21, 4 }
 0x411   :  { %v1163_v46 = vsel %vm151_vm6, %v1162_v14, %v1161_v15  ;;  %v1175_v53 = vsel %vm148_vm5, %v1174_v61, %v1173_v41  ;;  %v1183_v20 = vsel %vm139_vm2, %v1182_v16, %v1181_v32  ;;  %v1188_v11 = vrot.slane %v1125_v54, 3 }
 0x412   :  { %v1165_v59 = vsel %vm154_vm7, %v1164_v9, %v1163_v46  ;;  %v1177_v62 = vsel %vm151_vm6, %v1176_v6, %v1175_v53  ;;  %v1185_v39 = vsel %vm142_vm3, %v1184_v12, %v1183_v20  ;;  %v1190_v19 = vrot.slane %v1126_v5, 2 }
 0x413   :  { %v1179_v56 = vsel %vm154_vm7, %v1178_v34, %v1177_v62  ;;  %v1187_v17 = vsel %vm145_vm4, %v1186_v26, %v1185_v39  ;;  %1197 = vst.msk [vmem:[#allocation10] sm:$0xff] %vm184_vm8, %v1165_v59  ;;  %v1192_v35 = vrot.slane %v1127_v29, 1 }
 0x414   :  { %v1189_v51 = vsel %vm148_vm5, %v1188_v11, %v1187_v17  ;;  %1198 = vst.msk [vmem:[#allocation10 + $0x8] sm:$0xff] %vm184_vm8, %v1179_v56 }
 0x415   :  { %v1191_v58 = vsel %vm151_vm6, %v1190_v19, %v1189_v51 }
 0x416   :  { %v1193_v10 = vsel %vm154_vm7, %v1192_v35, %v1191_v58 }
 0x417   :  { %1199 = vst.msk [vmem:[#allocation10 + $0x10] sm:$0xff] %vm184_vm8, %v1193_v10 }
 0x418   :  { %1460 = shalt.err (!%p1457_p8)
}
 0x419   :  { %s1461_s19 = scalar_lea.hbm %s2174_s4, 384 }
 0x41a   :  { %p1462_p9 = scmp.ne.s32.totalorder %s2174_s4, %s1461_s19  ;;  %p1465_p10 = scmp.lt.u32.totalorder %s1461_s19, %s2174_s4 }
 0x41c   :  { %p1467_p11 = pnand %p1465_p10, %p1462_p9 }
 0x41e   :  { %1470 = shalt.err (!%p1467_p11)
}
 0x41f   :  { %1211 = dma.vmem_to_hbm [thread:$0]  %s1206_s15, 384, %s2174_s4, [#allocation4], %s1480_s25, %s1480_s25, %s1481_s26  }
 0x420   :  { %1477 = dma.done.wait [#allocation4], 384  }
 0x421   :  { %1478 = vsyncadd [#allocation4], 4294966912 }
 0x422   :  { %1215 = vsyncpa [#allocation3], 1 }
 0x423   :  { %1216 = vsyncpa [#allocation6], 1 }
 0x424   :  { %1217 = vsyncpa [#allocation9], 1 }
 0x425   :  { %1218 = vsyncpa [#allocation4], 1 }

</bundles_post_ra>
